<compile_context>
chip_gen: v5e
topology: v5e:2x2
jax: 0.10.0
libtpu: 0.0.40
codegen_flags: <defaults>
</compile_context>

<pallas_src>
import math

import jax
import jax.numpy as jnp
from jax.experimental import pallas as pl
from jax.experimental.pallas import tpu as pltpu


# ----------------------------------------------------------------------------
# Kernel A: fused multi-layer LSTM (single grid step, everything VMEM-resident)
# ----------------------------------------------------------------------------
def _make_lstm_kernel(num_layers, T, B, H):
    """refs = (x2d, [wihT, bias, whhT] * L, out, xg_sc, seq_sc)."""

    def kernel(*refs):
        f32 = jnp.float32
        x2d_ref = refs[0]                               # (T*B, D_in) time-major
        w_refs = refs[1:1 + 3 * num_layers]
        out_ref = refs[1 + 3 * num_layers]              # (T*B, H)
        xg_sc, seq_sc = refs[2 + 3 * num_layers:]

        layer_in_ref = x2d_ref
        for l in range(num_layers):
            wih_ref = w_refs[3 * l + 0]                 # (D_in, 4H)
            b_ref = w_refs[3 * l + 1]                   # (1, 4H)
            whh_ref = w_refs[3 * l + 2]                 # (H, 4H)

            # Hoisted input projection: one big matmul over the whole sequence.
            xg_sc[...] = (
                jnp.dot(layer_in_ref[...], wih_ref[...], preferred_element_type=f32)
                + b_ref[...]
            )

            whh = whh_ref[...]
            dst_ref = out_ref if l == num_layers - 1 else seq_sc
            h = jnp.zeros((B, H), f32)
            c = jnp.zeros((B, H), f32)
            # Fully-unrolled recurrence: only h @ W_hh is on the serial path.
            # PyTorch gate order: i, f, g, o.
            for t in range(T):
                gates = (xg_sc[t * B:(t + 1) * B, :]
                         + jnp.dot(h, whh, preferred_element_type=f32))
                i_g = jax.nn.sigmoid(gates[:, 0 * H:1 * H])
                f_g = jax.nn.sigmoid(gates[:, 1 * H:2 * H])
                g_g = jnp.tanh(gates[:, 2 * H:3 * H])
                o_g = jax.nn.sigmoid(gates[:, 3 * H:4 * H])
                c = f_g * c + i_g * g_g
                h = o_g * jnp.tanh(c)
                dst_ref[t * B:(t + 1) * B, :] = h
            layer_in_ref = seq_sc

    return kernel


def fused_lstm(x2d, lstm_params, T, B):
    """x2d: (T*B, D) time-major flattened. Returns last layer hidden seq (T*B, H)."""
    D = x2d.shape[1]
    H = lstm_params[0][1].shape[0]
    num_layers = len(lstm_params)

    inputs = [x2d]
    in_specs = [pl.BlockSpec((T * B, D), lambda i: (0, 0))]
    for (wihT, whhT, b) in lstm_params:
        inputs += [wihT, b, whhT]
        in_specs += [
            pl.BlockSpec(wihT.shape, lambda i: (0, 0)),
            pl.BlockSpec(b.shape, lambda i: (0, 0)),
            pl.BlockSpec(whhT.shape, lambda i: (0, 0)),
        ]

    return pl.pallas_call(
        _make_lstm_kernel(num_layers, T, B, H),
        out_shape=jax.ShapeDtypeStruct((T * B, H), jnp.float32),
        grid_spec=pltpu.PrefetchScalarGridSpec(
            num_scalar_prefetch=0,
            grid=(1,),
            in_specs=in_specs,
            out_specs=pl.BlockSpec((T * B, H), lambda i: (0, 0)),
            scratch_shapes=[
                pltpu.VMEM((T * B, 4 * H), jnp.float32),   # hoisted pre-activations
                pltpu.VMEM((T * B, H), jnp.float32),       # inter-layer hidden seq
            ],
        ),
        compiler_params=pltpu.CompilerParams(dimension_semantics=("arbitrary",)),
    )(*inputs)


# ----------------------------------------------------------------------------
# Kernel B: attention + final Linear, whole batch in a single invocation.
#   energies = Linear(lstm_out)                      (B, T, H)
#   scores   = bmm(energies, lstm_out^T)             (B, T, T)
#   attn     = softmax(scores, dim=1)
#   ctx      = bmm(attn, lstm_out)                   (B, T, H)
#   out      = ctx @ Wf + bf                         (B, T, O)
# ----------------------------------------------------------------------------
def _make_attn_fc_kernel(B, T, H, O):
    def kernel(lo_ref, wa_ref, ba_ref, wf_ref, bf_ref, out_ref):
        f32 = jnp.float32
        lo = lo_ref[...]                                            # (B, T, H)
        wa_b = jnp.broadcast_to(wa_ref[...], (B, H, H))
        e = jnp.einsum('bth,bhk->btk', lo, wa_b,
                       preferred_element_type=f32) + ba_ref[...]
        scores = jnp.einsum('bih,bjh->bij', e, lo,
                            preferred_element_type=f32)             # (B, T, T)
        # torch F.softmax(scores, dim=1): normalize over the first T axis (i).
        m = jnp.max(scores, axis=1, keepdims=True)
        p = jnp.exp(scores - m)
        attn = p * pl.reciprocal(jnp.sum(p, axis=1, keepdims=True), approx=True)
        ctx = jnp.einsum('bij,bjh->bih', attn, lo,
                         preferred_element_type=f32)                # (B, T, H)
        wf_b = jnp.broadcast_to(wf_ref[...], (B, H, O))
        out = jnp.einsum('bih,bho->bio', ctx, wf_b,
                         preferred_element_type=f32) + bf_ref[...]
        out_ref[...] = out.astype(out_ref.dtype)

    return kernel


def attention_fc(lstm_out, wa, ba, wf, bf):
    B, T, H = lstm_out.shape
    O = wf.shape[1]
    return pl.pallas_call(
        _make_attn_fc_kernel(B, T, H, O),
        out_shape=jax.ShapeDtypeStruct((B, T, O), jnp.float32),
        grid_spec=pltpu.PrefetchScalarGridSpec(
            num_scalar_prefetch=0,
            grid=(1,),
            in_specs=[
                pl.BlockSpec((B, T, H), lambda i: (0, 0, 0)),
                pl.BlockSpec((H, H), lambda i: (0, 0)),
                pl.BlockSpec((1, H), lambda i: (0, 0)),
                pl.BlockSpec((H, O), lambda i: (0, 0)),
                pl.BlockSpec((1, O), lambda i: (0, 0)),
            ],
            out_specs=pl.BlockSpec((B, T, O), lambda i: (0, 0, 0)),
        ),
        compiler_params=pltpu.CompilerParams(dimension_semantics=("arbitrary",)),
    )(lstm_out, wa, ba, wf, bf)


# ----------------------------------------------------------------------------
# Model wrapper (glue in plain JAX)
# ----------------------------------------------------------------------------
def model_forward(x, params):
    """x: (B, T, input_size) float32 -> (B, T, output_size) (or (B, O) if T==1)."""
    B0, T, D = x.shape
    Bp = ((max(B0, 8) + 7) // 8) * 8                 # pad batch to sublane multiple
    x_p = jnp.zeros((Bp, T, D), jnp.float32).at[:B0].set(x.astype(jnp.float32))
    # One transpose total before the layer stack: batch-major -> time-major.
    x2d = jnp.transpose(x_p, (1, 0, 2)).reshape(T * Bp, D)

    lstm_out_2d = fused_lstm(x2d, params["lstm"], T, Bp)          # (T*Bp, H)
    H = lstm_out_2d.shape[1]
    # One transpose total after the layer stack: back to batch-major for attention.
    lo = jnp.transpose(lstm_out_2d.reshape(T, Bp, H), (1, 0, 2))  # (Bp, T, H)

    out = attention_fc(lo, params["wa"], params["ba"], params["wf"], params["bf"])
    out = out[:B0]
    # torch .squeeze(1): only removes the seq dim when T == 1.
    if out.shape[1] == 1:
        out = out[:, 0, :]
    return out


def init_params(key, input_size, hidden_size, num_layers, output_size):
    params = {"lstm": []}
    k_lstm = 1.0 / math.sqrt(hidden_size)
    keys = jax.random.split(key, num_layers * 4 + 4)
    idx = 0
    in_dim = input_size
    for _ in range(num_layers):
        w_ih = jax.random.uniform(keys[idx], (4 * hidden_size, in_dim),
                                  minval=-k_lstm, maxval=k_lstm); idx += 1
        w_hh = jax.random.uniform(keys[idx], (4 * hidden_size, hidden_size),
                                  minval=-k_lstm, maxval=k_lstm); idx += 1
        b_ih = jax.random.uniform(keys[idx], (4 * hidden_size,),
                                  minval=-k_lstm, maxval=k_lstm); idx += 1
        b_hh = jax.random.uniform(keys[idx], (4 * hidden_size,),
                                  minval=-k_lstm, maxval=k_lstm); idx += 1
        params["lstm"].append(
            (w_ih.T.astype(jnp.float32),
             w_hh.T.astype(jnp.float32),
             (b_ih + b_hh)[None, :].astype(jnp.float32))
        )
        in_dim = hidden_size
    k_attn = 1.0 / math.sqrt(hidden_size)
    params["wa"] = jax.random.uniform(keys[idx], (hidden_size, hidden_size),
                                      minval=-k_attn, maxval=k_attn); idx += 1
    params["ba"] = jax.random.uniform(keys[idx], (1, hidden_size),
                                      minval=-k_attn, maxval=k_attn); idx += 1
    params["wf"] = jax.random.uniform(keys[idx], (hidden_size, output_size),
                                      minval=-k_attn, maxval=k_attn); idx += 1
    params["bf"] = jax.random.uniform(keys[idx], (1, output_size),
                                      minval=-k_attn, maxval=k_attn); idx += 1
    return params


# ----------------------------------------------------------------------------
# Pure-JAX reference (same math) for a correctness sanity check.
# ----------------------------------------------------------------------------
def _ref_lstm_layer(x, wihT, whhT, b):
    B, T, D = x.shape
    H = whhT.shape[0]

    def step(carry, x_t):
        h, c = carry
        gates = x_t @ wihT + h @ whhT + b
        i = jax.nn.sigmoid(gates[:, 0 * H:1 * H])
        f = jax.nn.sigmoid(gates[:, 1 * H:2 * H])
        g = jnp.tanh(gates[:, 2 * H:3 * H])
        o = jax.nn.sigmoid(gates[:, 3 * H:4 * H])
        c = f * c + i * g
        h = o * jnp.tanh(c)
        return (h, c), h

    init = (jnp.zeros((B, H), jnp.float32), jnp.zeros((B, H), jnp.float32))
    _, hs = jax.lax.scan(step, init, jnp.transpose(x, (1, 0, 2)))
    return jnp.transpose(hs, (1, 0, 2))


def ref_forward(x, params):
    h = x.astype(jnp.float32)
    for (wihT, whhT, b) in params["lstm"]:
        h = _ref_lstm_layer(h, wihT, whhT, b)
    e = h @ params["wa"] + params["ba"]
    scores = jnp.einsum("bth,bsh->bts", e, h)
    attn = jax.nn.softmax(scores, axis=1)
    ctx = jnp.einsum("bts,bsh->bth", attn, h)
    out = ctx @ params["wf"] + params["bf"]
    if out.shape[1] == 1:
        out = out[:, 0, :]
    return out


if __name__ == "__main__":
    B, T = 2, 8
    input_size, hidden_size, num_layers, output_size = 16, 32, 2, 8

    root = jax.random.PRNGKey(0)
    kx, kp = jax.random.split(root)
    x = jax.random.normal(kx, (B, T, input_size), dtype=jnp.float32)
    params = init_params(kp, input_size, hidden_size, num_layers, output_size)

    out = model_forward(x, params)
    out = jax.block_until_ready(out)

    ref = jax.block_until_ready(ref_forward(x, params))
    assert out.shape == ref.shape, (out.shape, ref.shape)
    assert jnp.allclose(out, ref, rtol=2e-3, atol=2e-3), float(jnp.max(jnp.abs(out - ref)))

    print("KERNEL_OK")
</pallas_src>

<mosaic_0001>
module attributes {stable_mosaic.version = 11 : i64} {
  func.func @kernel(%arg0: i32, %arg1: memref<64x16xf32, #tpu.memory_space<vmem>>, %arg2: memref<16x128xf32, #tpu.memory_space<vmem>>, %arg3: memref<1x128xf32, #tpu.memory_space<vmem>>, %arg4: memref<32x128xf32, #tpu.memory_space<vmem>>, %arg5: memref<32x128xf32, #tpu.memory_space<vmem>>, %arg6: memref<1x128xf32, #tpu.memory_space<vmem>>, %arg7: memref<32x128xf32, #tpu.memory_space<vmem>>, %arg8: memref<64x32xf32, #tpu.memory_space<vmem>>, %arg9: memref<64x128xf32, #tpu.memory_space<vmem>>, %arg10: memref<64x32xf32, #tpu.memory_space<vmem>>) attributes {dimension_semantics = [#tpu.dimension_semantics<arbitrary>], iteration_bounds = array<i64: 1>, scalar_prefetch = 0 : i64, scratch_operands = 2 : i64, tpu.core_type = #tpu.core_type<tc>, window_params = [{pipeline_mode = #tpu.pipeline_mode<synchronous>, transform_indices = @transform_0, window_bounds = array<i64: 64, 16>}, {pipeline_mode = #tpu.pipeline_mode<synchronous>, transform_indices = @transform_1, window_bounds = array<i64: 16, 128>}, {pipeline_mode = #tpu.pipeline_mode<synchronous>, transform_indices = @transform_2, window_bounds = array<i64: 1, 128>}, {pipeline_mode = #tpu.pipeline_mode<synchronous>, transform_indices = @transform_3, window_bounds = array<i64: 32, 128>}, {pipeline_mode = #tpu.pipeline_mode<synchronous>, transform_indices = @transform_4, window_bounds = array<i64: 32, 128>}, {pipeline_mode = #tpu.pipeline_mode<synchronous>, transform_indices = @transform_5, window_bounds = array<i64: 1, 128>}, {pipeline_mode = #tpu.pipeline_mode<synchronous>, transform_indices = @transform_6, window_bounds = array<i64: 32, 128>}, {pipeline_mode = #tpu.pipeline_mode<synchronous>, transform_indices = @transform_7, window_bounds = array<i64: 64, 32>}]} {
    %c0 = arith.constant 0 : index
    %c0_0 = arith.constant 0 : index
    %0 = vector.load %arg1[%c0, %c0_0] : memref<64x16xf32, #tpu.memory_space<vmem>>, vector<64x16xf32>
    %c0_1 = arith.constant 0 : index
    %c0_2 = arith.constant 0 : index
    %1 = vector.load %arg2[%c0_1, %c0_2] : memref<16x128xf32, #tpu.memory_space<vmem>>, vector<16x128xf32>
    %cst = arith.constant dense<0.000000e+00> : vector<64x128xf32>
    %2 = tpu.matmul %0, %1, %cst {dimension_numbers = #tpu.dot_dimension_numbers<[1], [0], [0], [1], [0, 0, 1, 1], [], []>} : vector<64x16xf32>, vector<16x128xf32>, vector<64x128xf32> -> vector<64x128xf32>
    %c0_3 = arith.constant 0 : index
    %c0_4 = arith.constant 0 : index
    %3 = vector.load %arg3[%c0_3, %c0_4] : memref<1x128xf32, #tpu.memory_space<vmem>>, vector<1x128xf32>
    %4 = vector.broadcast %3 : vector<1x128xf32> to vector<64x128xf32>
    %5 = arith.addf %2, %4 : vector<64x128xf32>
    %c0_5 = arith.constant 0 : index
    %c0_6 = arith.constant 0 : index
    %6 = vector.load %arg9[%c0_5, %c0_6] : memref<64x128xf32, #tpu.memory_space<vmem>>, vector<64x128xf32>
    tpu.vector_store %arg9[%c0_5, %c0_6], %5 {strides = array<i32>} : memref<64x128xf32, #tpu.memory_space<vmem>>, vector<64x128xf32>,
    %c0_7 = arith.constant 0 : index
    %c0_8 = arith.constant 0 : index
    %7 = vector.load %arg4[%c0_7, %c0_8] : memref<32x128xf32, #tpu.memory_space<vmem>>, vector<32x128xf32>
    %cst_9 = arith.constant 0.000000e+00 : f32
    %8 = vector.broadcast %cst_9 : f32 to vector<8x32xf32>
    %cst_10 = arith.constant 0.000000e+00 : f32
    %9 = vector.broadcast %cst_10 : f32 to vector<8x32xf32>
    %c0_11 = arith.constant 0 : index
    %c0_12 = arith.constant 0 : index
    %10 = vector.load %arg9[%c0_11, %c0_12] : memref<64x128xf32, #tpu.memory_space<vmem>>, vector<8x128xf32>
    %cst_13 = arith.constant dense<0.000000e+00> : vector<8x128xf32>
    %11 = tpu.matmul %8, %7, %cst_13 {dimension_numbers = #tpu.dot_dimension_numbers<[1], [0], [0], [1], [0, 0, 1, 1], [], []>} : vector<8x32xf32>, vector<32x128xf32>, vector<8x128xf32> -> vector<8x128xf32>
    %12 = arith.addf %10, %11 : vector<8x128xf32>
    %13 = vector.extract_strided_slice %12 {offsets = [0, 0], sizes = [8, 32], strides = [1, 1]} : vector<8x128xf32> to vector<8x32xf32>
    %14 = arith.negf %13 : vector<8x32xf32>
    %15 = math.exp %14 : vector<8x32xf32>
    %cst_14 = arith.constant 1.000000e+00 : f32
    %16 = vector.broadcast %cst_14 : f32 to vector<8x32xf32>
    %17 = arith.addf %16, %15 : vector<8x32xf32>
    %18 = arith.divf %16, %17 : vector<8x32xf32>
    %19 = vector.extract_strided_slice %12 {offsets = [0, 32], sizes = [8, 32], strides = [1, 1]} : vector<8x128xf32> to vector<8x32xf32>
    %20 = arith.negf %19 : vector<8x32xf32>
    %21 = math.exp %20 : vector<8x32xf32>
    %cst_15 = arith.constant 1.000000e+00 : f32
    %22 = vector.broadcast %cst_15 : f32 to vector<8x32xf32>
    %23 = arith.addf %22, %21 : vector<8x32xf32>
    %24 = arith.divf %22, %23 : vector<8x32xf32>
    %25 = vector.extract_strided_slice %12 {offsets = [0, 64], sizes = [8, 32], strides = [1, 1]} : vector<8x128xf32> to vector<8x32xf32>
    %26 = math.tanh %25 : vector<8x32xf32>
    %27 = vector.extract_strided_slice %12 {offsets = [0, 96], sizes = [8, 32], strides = [1, 1]} : vector<8x128xf32> to vector<8x32xf32>
    %28 = arith.negf %27 : vector<8x32xf32>
    %29 = math.exp %28 : vector<8x32xf32>
    %cst_16 = arith.constant 1.000000e+00 : f32
    %30 = vector.broadcast %cst_16 : f32 to vector<8x32xf32>
    %31 = arith.addf %30, %29 : vector<8x32xf32>
    %32 = arith.divf %30, %31 : vector<8x32xf32>
    %33 = arith.mulf %24, %9 : vector<8x32xf32>
    %34 = arith.mulf %18, %26 : vector<8x32xf32>
    %35 = arith.addf %33, %34 : vector<8x32xf32>
    %36 = math.tanh %35 : vector<8x32xf32>
    %37 = arith.mulf %32, %36 : vector<8x32xf32>
    %c0_17 = arith.constant 0 : index
    %c0_18 = arith.constant 0 : index
    %38 = vector.load %arg10[%c0_17, %c0_18] : memref<64x32xf32, #tpu.memory_space<vmem>>, vector<8x32xf32>
    tpu.vector_store %arg10[%c0_17, %c0_18], %37 {strides = array<i32>} : memref<64x32xf32, #tpu.memory_space<vmem>>, vector<8x32xf32>,
    %c8 = arith.constant 8 : index
    %c0_19 = arith.constant 0 : index
    %39 = vector.load %arg9[%c8, %c0_19] : memref<64x128xf32, #tpu.memory_space<vmem>>, vector<8x128xf32>
    %cst_20 = arith.constant dense<0.000000e+00> : vector<8x128xf32>
    %40 = tpu.matmul %37, %7, %cst_20 {dimension_numbers = #tpu.dot_dimension_numbers<[1], [0], [0], [1], [0, 0, 1, 1], [], []>} : vector<8x32xf32>, vector<32x128xf32>, vector<8x128xf32> -> vector<8x128xf32>
    %41 = arith.addf %39, %40 : vector<8x128xf32>
    %42 = vector.extract_strided_slice %41 {offsets = [0, 0], sizes = [8, 32], strides = [1, 1]} : vector<8x128xf32> to vector<8x32xf32>
    %43 = arith.negf %42 : vector<8x32xf32>
    %44 = math.exp %43 : vector<8x32xf32>
    %cst_21 = arith.constant 1.000000e+00 : f32
    %45 = vector.broadcast %cst_21 : f32 to vector<8x32xf32>
    %46 = arith.addf %45, %44 : vector<8x32xf32>
    %47 = arith.divf %45, %46 : vector<8x32xf32>
    %48 = vector.extract_strided_slice %41 {offsets = [0, 32], sizes = [8, 32], strides = [1, 1]} : vector<8x128xf32> to vector<8x32xf32>
    %49 = arith.negf %48 : vector<8x32xf32>
    %50 = math.exp %49 : vector<8x32xf32>
    %cst_22 = arith.constant 1.000000e+00 : f32
    %51 = vector.broadcast %cst_22 : f32 to vector<8x32xf32>
    %52 = arith.addf %51, %50 : vector<8x32xf32>
    %53 = arith.divf %51, %52 : vector<8x32xf32>
    %54 = vector.extract_strided_slice %41 {offsets = [0, 64], sizes = [8, 32], strides = [1, 1]} : vector<8x128xf32> to vector<8x32xf32>
    %55 = math.tanh %54 : vector<8x32xf32>
    %56 = vector.extract_strided_slice %41 {offsets = [0, 96], sizes = [8, 32], strides = [1, 1]} : vector<8x128xf32> to vector<8x32xf32>
    %57 = arith.negf %56 : vector<8x32xf32>
    %58 = math.exp %57 : vector<8x32xf32>
    %cst_23 = arith.constant 1.000000e+00 : f32
    %59 = vector.broadcast %cst_23 : f32 to vector<8x32xf32>
    %60 = arith.addf %59, %58 : vector<8x32xf32>
    %61 = arith.divf %59, %60 : vector<8x32xf32>
    %62 = arith.mulf %53, %35 : vector<8x32xf32>
    %63 = arith.mulf %47, %55 : vector<8x32xf32>
    %64 = arith.addf %62, %63 : vector<8x32xf32>
    %65 = math.tanh %64 : vector<8x32xf32>
    %66 = arith.mulf %61, %65 : vector<8x32xf32>
    %c8_24 = arith.constant 8 : index
    %c0_25 = arith.constant 0 : index
    %67 = vector.load %arg10[%c8_24, %c0_25] : memref<64x32xf32, #tpu.memory_space<vmem>>, vector<8x32xf32>
    tpu.vector_store %arg10[%c8_24, %c0_25], %66 {strides = array<i32>} : memref<64x32xf32, #tpu.memory_space<vmem>>, vector<8x32xf32>,
    %c16 = arith.constant 16 : index
    %c0_26 = arith.constant 0 : index
    %68 = vector.load %arg9[%c16, %c0_26] : memref<64x128xf32, #tpu.memory_space<vmem>>, vector<8x128xf32>
    %cst_27 = arith.constant dense<0.000000e+00> : vector<8x128xf32>
    %69 = tpu.matmul %66, %7, %cst_27 {dimension_numbers = #tpu.dot_dimension_numbers<[1], [0], [0], [1], [0, 0, 1, 1], [], []>} : vector<8x32xf32>, vector<32x128xf32>, vector<8x128xf32> -> vector<8x128xf32>
    %70 = arith.addf %68, %69 : vector<8x128xf32>
    %71 = vector.extract_strided_slice %70 {offsets = [0, 0], sizes = [8, 32], strides = [1, 1]} : vector<8x128xf32> to vector<8x32xf32>
    %72 = arith.negf %71 : vector<8x32xf32>
    %73 = math.exp %72 : vector<8x32xf32>
    %cst_28 = arith.constant 1.000000e+00 : f32
    %74 = vector.broadcast %cst_28 : f32 to vector<8x32xf32>
    %75 = arith.addf %74, %73 : vector<8x32xf32>
    %76 = arith.divf %74, %75 : vector<8x32xf32>
    %77 = vector.extract_strided_slice %70 {offsets = [0, 32], sizes = [8, 32], strides = [1, 1]} : vector<8x128xf32> to vector<8x32xf32>
    %78 = arith.negf %77 : vector<8x32xf32>
    %79 = math.exp %78 : vector<8x32xf32>
    %cst_29 = arith.constant 1.000000e+00 : f32
    %80 = vector.broadcast %cst_29 : f32 to vector<8x32xf32>
    %81 = arith.addf %80, %79 : vector<8x32xf32>
    %82 = arith.divf %80, %81 : vector<8x32xf32>
    %83 = vector.extract_strided_slice %70 {offsets = [0, 64], sizes = [8, 32], strides = [1, 1]} : vector<8x128xf32> to vector<8x32xf32>
    %84 = math.tanh %83 : vector<8x32xf32>
    %85 = vector.extract_strided_slice %70 {offsets = [0, 96], sizes = [8, 32], strides = [1, 1]} : vector<8x128xf32> to vector<8x32xf32>
    %86 = arith.negf %85 : vector<8x32xf32>
    %87 = math.exp %86 : vector<8x32xf32>
    %cst_30 = arith.constant 1.000000e+00 : f32
    %88 = vector.broadcast %cst_30 : f32 to vector<8x32xf32>
    %89 = arith.addf %88, %87 : vector<8x32xf32>
    %90 = arith.divf %88, %89 : vector<8x32xf32>
    %91 = arith.mulf %82, %64 : vector<8x32xf32>
    %92 = arith.mulf %76, %84 : vector<8x32xf32>
    %93 = arith.addf %91, %92 : vector<8x32xf32>
    %94 = math.tanh %93 : vector<8x32xf32>
    %95 = arith.mulf %90, %94 : vector<8x32xf32>
    %c16_31 = arith.constant 16 : index
    %c0_32 = arith.constant 0 : index
    %96 = vector.load %arg10[%c16_31, %c0_32] : memref<64x32xf32, #tpu.memory_space<vmem>>, vector<8x32xf32>
    tpu.vector_store %arg10[%c16_31, %c0_32], %95 {strides = array<i32>} : memref<64x32xf32, #tpu.memory_space<vmem>>, vector<8x32xf32>,
    %c24 = arith.constant 24 : index
    %c0_33 = arith.constant 0 : index
    %97 = vector.load %arg9[%c24, %c0_33] : memref<64x128xf32, #tpu.memory_space<vmem>>, vector<8x128xf32>
    %cst_34 = arith.constant dense<0.000000e+00> : vector<8x128xf32>
    %98 = tpu.matmul %95, %7, %cst_34 {dimension_numbers = #tpu.dot_dimension_numbers<[1], [0], [0], [1], [0, 0, 1, 1], [], []>} : vector<8x32xf32>, vector<32x128xf32>, vector<8x128xf32> -> vector<8x128xf32>
    %99 = arith.addf %97, %98 : vector<8x128xf32>
    %100 = vector.extract_strided_slice %99 {offsets = [0, 0], sizes = [8, 32], strides = [1, 1]} : vector<8x128xf32> to vector<8x32xf32>
    %101 = arith.negf %100 : vector<8x32xf32>
    %102 = math.exp %101 : vector<8x32xf32>
    %cst_35 = arith.constant 1.000000e+00 : f32
    %103 = vector.broadcast %cst_35 : f32 to vector<8x32xf32>
    %104 = arith.addf %103, %102 : vector<8x32xf32>
    %105 = arith.divf %103, %104 : vector<8x32xf32>
    %106 = vector.extract_strided_slice %99 {offsets = [0, 32], sizes = [8, 32], strides = [1, 1]} : vector<8x128xf32> to vector<8x32xf32>
    %107 = arith.negf %106 : vector<8x32xf32>
    %108 = math.exp %107 : vector<8x32xf32>
    %cst_36 = arith.constant 1.000000e+00 : f32
    %109 = vector.broadcast %cst_36 : f32 to vector<8x32xf32>
    %110 = arith.addf %109, %108 : vector<8x32xf32>
    %111 = arith.divf %109, %110 : vector<8x32xf32>
    %112 = vector.extract_strided_slice %99 {offsets = [0, 64], sizes = [8, 32], strides = [1, 1]} : vector<8x128xf32> to vector<8x32xf32>
    %113 = math.tanh %112 : vector<8x32xf32>
    %114 = vector.extract_strided_slice %99 {offsets = [0, 96], sizes = [8, 32], strides = [1, 1]} : vector<8x128xf32> to vector<8x32xf32>
    %115 = arith.negf %114 : vector<8x32xf32>
    %116 = math.exp %115 : vector<8x32xf32>
    %cst_37 = arith.constant 1.000000e+00 : f32
    %117 = vector.broadcast %cst_37 : f32 to vector<8x32xf32>
    %118 = arith.addf %117, %116 : vector<8x32xf32>
    %119 = arith.divf %117, %118 : vector<8x32xf32>
    %120 = arith.mulf %111, %93 : vector<8x32xf32>
    %121 = arith.mulf %105, %113 : vector<8x32xf32>
    %122 = arith.addf %120, %121 : vector<8x32xf32>
    %123 = math.tanh %122 : vector<8x32xf32>
    %124 = arith.mulf %119, %123 : vector<8x32xf32>
    %c24_38 = arith.constant 24 : index
    %c0_39 = arith.constant 0 : index
    %125 = vector.load %arg10[%c24_38, %c0_39] : memref<64x32xf32, #tpu.memory_space<vmem>>, vector<8x32xf32>
    tpu.vector_store %arg10[%c24_38, %c0_39], %124 {strides = array<i32>} : memref<64x32xf32, #tpu.memory_space<vmem>>, vector<8x32xf32>,
    %c32 = arith.constant 32 : index
    %c0_40 = arith.constant 0 : index
    %126 = vector.load %arg9[%c32, %c0_40] : memref<64x128xf32, #tpu.memory_space<vmem>>, vector<8x128xf32>
    %cst_41 = arith.constant dense<0.000000e+00> : vector<8x128xf32>
    %127 = tpu.matmul %124, %7, %cst_41 {dimension_numbers = #tpu.dot_dimension_numbers<[1], [0], [0], [1], [0, 0, 1, 1], [], []>} : vector<8x32xf32>, vector<32x128xf32>, vector<8x128xf32> -> vector<8x128xf32>
    %128 = arith.addf %126, %127 : vector<8x128xf32>
    %129 = vector.extract_strided_slice %128 {offsets = [0, 0], sizes = [8, 32], strides = [1, 1]} : vector<8x128xf32> to vector<8x32xf32>
    %130 = arith.negf %129 : vector<8x32xf32>
    %131 = math.exp %130 : vector<8x32xf32>
    %cst_42 = arith.constant 1.000000e+00 : f32
    %132 = vector.broadcast %cst_42 : f32 to vector<8x32xf32>
    %133 = arith.addf %132, %131 : vector<8x32xf32>
    %134 = arith.divf %132, %133 : vector<8x32xf32>
    %135 = vector.extract_strided_slice %128 {offsets = [0, 32], sizes = [8, 32], strides = [1, 1]} : vector<8x128xf32> to vector<8x32xf32>
    %136 = arith.negf %135 : vector<8x32xf32>
    %137 = math.exp %136 : vector<8x32xf32>
    %cst_43 = arith.constant 1.000000e+00 : f32
    %138 = vector.broadcast %cst_43 : f32 to vector<8x32xf32>
    %139 = arith.addf %138, %137 : vector<8x32xf32>
    %140 = arith.divf %138, %139 : vector<8x32xf32>
    %141 = vector.extract_strided_slice %128 {offsets = [0, 64], sizes = [8, 32], strides = [1, 1]} : vector<8x128xf32> to vector<8x32xf32>
    %142 = math.tanh %141 : vector<8x32xf32>
    %143 = vector.extract_strided_slice %128 {offsets = [0, 96], sizes = [8, 32], strides = [1, 1]} : vector<8x128xf32> to vector<8x32xf32>
    %144 = arith.negf %143 : vector<8x32xf32>
    %145 = math.exp %144 : vector<8x32xf32>
    %cst_44 = arith.constant 1.000000e+00 : f32
    %146 = vector.broadcast %cst_44 : f32 to vector<8x32xf32>
    %147 = arith.addf %146, %145 : vector<8x32xf32>
    %148 = arith.divf %146, %147 : vector<8x32xf32>
    %149 = arith.mulf %140, %122 : vector<8x32xf32>
    %150 = arith.mulf %134, %142 : vector<8x32xf32>
    %151 = arith.addf %149, %150 : vector<8x32xf32>
    %152 = math.tanh %151 : vector<8x32xf32>
    %153 = arith.mulf %148, %152 : vector<8x32xf32>
    %c32_45 = arith.constant 32 : index
    %c0_46 = arith.constant 0 : index
    %154 = vector.load %arg10[%c32_45, %c0_46] : memref<64x32xf32, #tpu.memory_space<vmem>>, vector<8x32xf32>
    tpu.vector_store %arg10[%c32_45, %c0_46], %153 {strides = array<i32>} : memref<64x32xf32, #tpu.memory_space<vmem>>, vector<8x32xf32>,
    %c40 = arith.constant 40 : index
    %c0_47 = arith.constant 0 : index
    %155 = vector.load %arg9[%c40, %c0_47] : memref<64x128xf32, #tpu.memory_space<vmem>>, vector<8x128xf32>
    %cst_48 = arith.constant dense<0.000000e+00> : vector<8x128xf32>
    %156 = tpu.matmul %153, %7, %cst_48 {dimension_numbers = #tpu.dot_dimension_numbers<[1], [0], [0], [1], [0, 0, 1, 1], [], []>} : vector<8x32xf32>, vector<32x128xf32>, vector<8x128xf32> -> vector<8x128xf32>
    %157 = arith.addf %155, %156 : vector<8x128xf32>
    %158 = vector.extract_strided_slice %157 {offsets = [0, 0], sizes = [8, 32], strides = [1, 1]} : vector<8x128xf32> to vector<8x32xf32>
    %159 = arith.negf %158 : vector<8x32xf32>
    %160 = math.exp %159 : vector<8x32xf32>
    %cst_49 = arith.constant 1.000000e+00 : f32
    %161 = vector.broadcast %cst_49 : f32 to vector<8x32xf32>
    %162 = arith.addf %161, %160 : vector<8x32xf32>
    %163 = arith.divf %161, %162 : vector<8x32xf32>
    %164 = vector.extract_strided_slice %157 {offsets = [0, 32], sizes = [8, 32], strides = [1, 1]} : vector<8x128xf32> to vector<8x32xf32>
    %165 = arith.negf %164 : vector<8x32xf32>
    %166 = math.exp %165 : vector<8x32xf32>
    %cst_50 = arith.constant 1.000000e+00 : f32
    %167 = vector.broadcast %cst_50 : f32 to vector<8x32xf32>
    %168 = arith.addf %167, %166 : vector<8x32xf32>
    %169 = arith.divf %167, %168 : vector<8x32xf32>
    %170 = vector.extract_strided_slice %157 {offsets = [0, 64], sizes = [8, 32], strides = [1, 1]} : vector<8x128xf32> to vector<8x32xf32>
    %171 = math.tanh %170 : vector<8x32xf32>
    %172 = vector.extract_strided_slice %157 {offsets = [0, 96], sizes = [8, 32], strides = [1, 1]} : vector<8x128xf32> to vector<8x32xf32>
    %173 = arith.negf %172 : vector<8x32xf32>
    %174 = math.exp %173 : vector<8x32xf32>
    %cst_51 = arith.constant 1.000000e+00 : f32
    %175 = vector.broadcast %cst_51 : f32 to vector<8x32xf32>
    %176 = arith.addf %175, %174 : vector<8x32xf32>
    %177 = arith.divf %175, %176 : vector<8x32xf32>
    %178 = arith.mulf %169, %151 : vector<8x32xf32>
    %179 = arith.mulf %163, %171 : vector<8x32xf32>
    %180 = arith.addf %178, %179 : vector<8x32xf32>
    %181 = math.tanh %180 : vector<8x32xf32>
    %182 = arith.mulf %177, %181 : vector<8x32xf32>
    %c40_52 = arith.constant 40 : index
    %c0_53 = arith.constant 0 : index
    %183 = vector.load %arg10[%c40_52, %c0_53] : memref<64x32xf32, #tpu.memory_space<vmem>>, vector<8x32xf32>
    tpu.vector_store %arg10[%c40_52, %c0_53], %182 {strides = array<i32>} : memref<64x32xf32, #tpu.memory_space<vmem>>, vector<8x32xf32>,
    %c48 = arith.constant 48 : index
    %c0_54 = arith.constant 0 : index
    %184 = vector.load %arg9[%c48, %c0_54] : memref<64x128xf32, #tpu.memory_space<vmem>>, vector<8x128xf32>
    %cst_55 = arith.constant dense<0.000000e+00> : vector<8x128xf32>
    %185 = tpu.matmul %182, %7, %cst_55 {dimension_numbers = #tpu.dot_dimension_numbers<[1], [0], [0], [1], [0, 0, 1, 1], [], []>} : vector<8x32xf32>, vector<32x128xf32>, vector<8x128xf32> -> vector<8x128xf32>
    %186 = arith.addf %184, %185 : vector<8x128xf32>
    %187 = vector.extract_strided_slice %186 {offsets = [0, 0], sizes = [8, 32], strides = [1, 1]} : vector<8x128xf32> to vector<8x32xf32>
    %188 = arith.negf %187 : vector<8x32xf32>
    %189 = math.exp %188 : vector<8x32xf32>
    %cst_56 = arith.constant 1.000000e+00 : f32
    %190 = vector.broadcast %cst_56 : f32 to vector<8x32xf32>
    %191 = arith.addf %190, %189 : vector<8x32xf32>
    %192 = arith.divf %190, %191 : vector<8x32xf32>
    %193 = vector.extract_strided_slice %186 {offsets = [0, 32], sizes = [8, 32], strides = [1, 1]} : vector<8x128xf32> to vector<8x32xf32>
    %194 = arith.negf %193 : vector<8x32xf32>
    %195 = math.exp %194 : vector<8x32xf32>
    %cst_57 = arith.constant 1.000000e+00 : f32
    %196 = vector.broadcast %cst_57 : f32 to vector<8x32xf32>
    %197 = arith.addf %196, %195 : vector<8x32xf32>
    %198 = arith.divf %196, %197 : vector<8x32xf32>
    %199 = vector.extract_strided_slice %186 {offsets = [0, 64], sizes = [8, 32], strides = [1, 1]} : vector<8x128xf32> to vector<8x32xf32>
    %200 = math.tanh %199 : vector<8x32xf32>
    %201 = vector.extract_strided_slice %186 {offsets = [0, 96], sizes = [8, 32], strides = [1, 1]} : vector<8x128xf32> to vector<8x32xf32>
    %202 = arith.negf %201 : vector<8x32xf32>
    %203 = math.exp %202 : vector<8x32xf32>
    %cst_58 = arith.constant 1.000000e+00 : f32
    %204 = vector.broadcast %cst_58 : f32 to vector<8x32xf32>
    %205 = arith.addf %204, %203 : vector<8x32xf32>
    %206 = arith.divf %204, %205 : vector<8x32xf32>
    %207 = arith.mulf %198, %180 : vector<8x32xf32>
    %208 = arith.mulf %192, %200 : vector<8x32xf32>
    %209 = arith.addf %207, %208 : vector<8x32xf32>
    %210 = math.tanh %209 : vector<8x32xf32>
    %211 = arith.mulf %206, %210 : vector<8x32xf32>
    %c48_59 = arith.constant 48 : index
    %c0_60 = arith.constant 0 : index
    %212 = vector.load %arg10[%c48_59, %c0_60] : memref<64x32xf32, #tpu.memory_space<vmem>>, vector<8x32xf32>
    tpu.vector_store %arg10[%c48_59, %c0_60], %211 {strides = array<i32>} : memref<64x32xf32, #tpu.memory_space<vmem>>, vector<8x32xf32>,
    %c56 = arith.constant 56 : index
    %c0_61 = arith.constant 0 : index
    %213 = vector.load %arg9[%c56, %c0_61] : memref<64x128xf32, #tpu.memory_space<vmem>>, vector<8x128xf32>
    %cst_62 = arith.constant dense<0.000000e+00> : vector<8x128xf32>
    %214 = tpu.matmul %211, %7, %cst_62 {dimension_numbers = #tpu.dot_dimension_numbers<[1], [0], [0], [1], [0, 0, 1, 1], [], []>} : vector<8x32xf32>, vector<32x128xf32>, vector<8x128xf32> -> vector<8x128xf32>
    %215 = arith.addf %213, %214 : vector<8x128xf32>
    %216 = vector.extract_strided_slice %215 {offsets = [0, 0], sizes = [8, 32], strides = [1, 1]} : vector<8x128xf32> to vector<8x32xf32>
    %217 = arith.negf %216 : vector<8x32xf32>
    %218 = math.exp %217 : vector<8x32xf32>
    %cst_63 = arith.constant 1.000000e+00 : f32
    %219 = vector.broadcast %cst_63 : f32 to vector<8x32xf32>
    %220 = arith.addf %219, %218 : vector<8x32xf32>
    %221 = arith.divf %219, %220 : vector<8x32xf32>
    %222 = vector.extract_strided_slice %215 {offsets = [0, 32], sizes = [8, 32], strides = [1, 1]} : vector<8x128xf32> to vector<8x32xf32>
    %223 = arith.negf %222 : vector<8x32xf32>
    %224 = math.exp %223 : vector<8x32xf32>
    %cst_64 = arith.constant 1.000000e+00 : f32
    %225 = vector.broadcast %cst_64 : f32 to vector<8x32xf32>
    %226 = arith.addf %225, %224 : vector<8x32xf32>
    %227 = arith.divf %225, %226 : vector<8x32xf32>
    %228 = vector.extract_strided_slice %215 {offsets = [0, 64], sizes = [8, 32], strides = [1, 1]} : vector<8x128xf32> to vector<8x32xf32>
    %229 = math.tanh %228 : vector<8x32xf32>
    %230 = vector.extract_strided_slice %215 {offsets = [0, 96], sizes = [8, 32], strides = [1, 1]} : vector<8x128xf32> to vector<8x32xf32>
    %231 = arith.negf %230 : vector<8x32xf32>
    %232 = math.exp %231 : vector<8x32xf32>
    %cst_65 = arith.constant 1.000000e+00 : f32
    %233 = vector.broadcast %cst_65 : f32 to vector<8x32xf32>
    %234 = arith.addf %233, %232 : vector<8x32xf32>
    %235 = arith.divf %233, %234 : vector<8x32xf32>
    %236 = arith.mulf %227, %209 : vector<8x32xf32>
    %237 = arith.mulf %221, %229 : vector<8x32xf32>
    %238 = arith.addf %236, %237 : vector<8x32xf32>
    %239 = math.tanh %238 : vector<8x32xf32>
    %240 = arith.mulf %235, %239 : vector<8x32xf32>
    %c56_66 = arith.constant 56 : index
    %c0_67 = arith.constant 0 : index
    %241 = vector.load %arg10[%c56_66, %c0_67] : memref<64x32xf32, #tpu.memory_space<vmem>>, vector<8x32xf32>
    tpu.vector_store %arg10[%c56_66, %c0_67], %240 {strides = array<i32>} : memref<64x32xf32, #tpu.memory_space<vmem>>, vector<8x32xf32>,
    %c0_68 = arith.constant 0 : index
    %c0_69 = arith.constant 0 : index
    %242 = vector.load %arg10[%c0_68, %c0_69] : memref<64x32xf32, #tpu.memory_space<vmem>>, vector<64x32xf32>
    %c0_70 = arith.constant 0 : index
    %c0_71 = arith.constant 0 : index
    %243 = vector.load %arg5[%c0_70, %c0_71] : memref<32x128xf32, #tpu.memory_space<vmem>>, vector<32x128xf32>
    %cst_72 = arith.constant dense<0.000000e+00> : vector<64x128xf32>
    %244 = tpu.matmul %242, %243, %cst_72 {dimension_numbers = #tpu.dot_dimension_numbers<[1], [0], [0], [1], [0, 0, 1, 1], [], []>} : vector<64x32xf32>, vector<32x128xf32>, vector<64x128xf32> -> vector<64x128xf32>
    %c0_73 = arith.constant 0 : index
    %c0_74 = arith.constant 0 : index
    %245 = vector.load %arg6[%c0_73, %c0_74] : memref<1x128xf32, #tpu.memory_space<vmem>>, vector<1x128xf32>
    %246 = vector.broadcast %245 : vector<1x128xf32> to vector<64x128xf32>
    %247 = arith.addf %244, %246 : vector<64x128xf32>
    %c0_75 = arith.constant 0 : index
    %c0_76 = arith.constant 0 : index
    %248 = vector.load %arg9[%c0_75, %c0_76] : memref<64x128xf32, #tpu.memory_space<vmem>>, vector<64x128xf32>
    tpu.vector_store %arg9[%c0_75, %c0_76], %247 {strides = array<i32>} : memref<64x128xf32, #tpu.memory_space<vmem>>, vector<64x128xf32>,
    %c0_77 = arith.constant 0 : index
    %c0_78 = arith.constant 0 : index
    %249 = vector.load %arg7[%c0_77, %c0_78] : memref<32x128xf32, #tpu.memory_space<vmem>>, vector<32x128xf32>
    %cst_79 = arith.constant 0.000000e+00 : f32
    %250 = vector.broadcast %cst_79 : f32 to vector<8x32xf32>
    %cst_80 = arith.constant 0.000000e+00 : f32
    %251 = vector.broadcast %cst_80 : f32 to vector<8x32xf32>
    %c0_81 = arith.constant 0 : index
    %c0_82 = arith.constant 0 : index
    %252 = vector.load %arg9[%c0_81, %c0_82] : memref<64x128xf32, #tpu.memory_space<vmem>>, vector<8x128xf32>
    %cst_83 = arith.constant dense<0.000000e+00> : vector<8x128xf32>
    %253 = tpu.matmul %250, %249, %cst_83 {dimension_numbers = #tpu.dot_dimension_numbers<[1], [0], [0], [1], [0, 0, 1, 1], [], []>} : vector<8x32xf32>, vector<32x128xf32>, vector<8x128xf32> -> vector<8x128xf32>
    %254 = arith.addf %252, %253 : vector<8x128xf32>
    %255 = vector.extract_strided_slice %254 {offsets = [0, 0], sizes = [8, 32], strides = [1, 1]} : vector<8x128xf32> to vector<8x32xf32>
    %256 = arith.negf %255 : vector<8x32xf32>
    %257 = math.exp %256 : vector<8x32xf32>
    %cst_84 = arith.constant 1.000000e+00 : f32
    %258 = vector.broadcast %cst_84 : f32 to vector<8x32xf32>
    %259 = arith.addf %258, %257 : vector<8x32xf32>
    %260 = arith.divf %258, %259 : vector<8x32xf32>
    %261 = vector.extract_strided_slice %254 {offsets = [0, 32], sizes = [8, 32], strides = [1, 1]} : vector<8x128xf32> to vector<8x32xf32>
    %262 = arith.negf %261 : vector<8x32xf32>
    %263 = math.exp %262 : vector<8x32xf32>
    %cst_85 = arith.constant 1.000000e+00 : f32
    %264 = vector.broadcast %cst_85 : f32 to vector<8x32xf32>
    %265 = arith.addf %264, %263 : vector<8x32xf32>
    %266 = arith.divf %264, %265 : vector<8x32xf32>
    %267 = vector.extract_strided_slice %254 {offsets = [0, 64], sizes = [8, 32], strides = [1, 1]} : vector<8x128xf32> to vector<8x32xf32>
    %268 = math.tanh %267 : vector<8x32xf32>
    %269 = vector.extract_strided_slice %254 {offsets = [0, 96], sizes = [8, 32], strides = [1, 1]} : vector<8x128xf32> to vector<8x32xf32>
    %270 = arith.negf %269 : vector<8x32xf32>
    %271 = math.exp %270 : vector<8x32xf32>
    %cst_86 = arith.constant 1.000000e+00 : f32
    %272 = vector.broadcast %cst_86 : f32 to vector<8x32xf32>
    %273 = arith.addf %272, %271 : vector<8x32xf32>
    %274 = arith.divf %272, %273 : vector<8x32xf32>
    %275 = arith.mulf %266, %251 : vector<8x32xf32>
    %276 = arith.mulf %260, %268 : vector<8x32xf32>
    %277 = arith.addf %275, %276 : vector<8x32xf32>
    %278 = math.tanh %277 : vector<8x32xf32>
    %279 = arith.mulf %274, %278 : vector<8x32xf32>
    %c0_87 = arith.constant 0 : index
    %c0_88 = arith.constant 0 : index
    %280 = vector.load %arg8[%c0_87, %c0_88] : memref<64x32xf32, #tpu.memory_space<vmem>>, vector<8x32xf32>
    tpu.vector_store %arg8[%c0_87, %c0_88], %279 {strides = array<i32>} : memref<64x32xf32, #tpu.memory_space<vmem>>, vector<8x32xf32>,
    %c8_89 = arith.constant 8 : index
    %c0_90 = arith.constant 0 : index
    %281 = vector.load %arg9[%c8_89, %c0_90] : memref<64x128xf32, #tpu.memory_space<vmem>>, vector<8x128xf32>
    %cst_91 = arith.constant dense<0.000000e+00> : vector<8x128xf32>
    %282 = tpu.matmul %279, %249, %cst_91 {dimension_numbers = #tpu.dot_dimension_numbers<[1], [0], [0], [1], [0, 0, 1, 1], [], []>} : vector<8x32xf32>, vector<32x128xf32>, vector<8x128xf32> -> vector<8x128xf32>
    %283 = arith.addf %281, %282 : vector<8x128xf32>
    %284 = vector.extract_strided_slice %283 {offsets = [0, 0], sizes = [8, 32], strides = [1, 1]} : vector<8x128xf32> to vector<8x32xf32>
    %285 = arith.negf %284 : vector<8x32xf32>
    %286 = math.exp %285 : vector<8x32xf32>
    %cst_92 = arith.constant 1.000000e+00 : f32
    %287 = vector.broadcast %cst_92 : f32 to vector<8x32xf32>
    %288 = arith.addf %287, %286 : vector<8x32xf32>
    %289 = arith.divf %287, %288 : vector<8x32xf32>
    %290 = vector.extract_strided_slice %283 {offsets = [0, 32], sizes = [8, 32], strides = [1, 1]} : vector<8x128xf32> to vector<8x32xf32>
    %291 = arith.negf %290 : vector<8x32xf32>
    %292 = math.exp %291 : vector<8x32xf32>
    %cst_93 = arith.constant 1.000000e+00 : f32
    %293 = vector.broadcast %cst_93 : f32 to vector<8x32xf32>
    %294 = arith.addf %293, %292 : vector<8x32xf32>
    %295 = arith.divf %293, %294 : vector<8x32xf32>
    %296 = vector.extract_strided_slice %283 {offsets = [0, 64], sizes = [8, 32], strides = [1, 1]} : vector<8x128xf32> to vector<8x32xf32>
    %297 = math.tanh %296 : vector<8x32xf32>
    %298 = vector.extract_strided_slice %283 {offsets = [0, 96], sizes = [8, 32], strides = [1, 1]} : vector<8x128xf32> to vector<8x32xf32>
    %299 = arith.negf %298 : vector<8x32xf32>
    %300 = math.exp %299 : vector<8x32xf32>
    %cst_94 = arith.constant 1.000000e+00 : f32
    %301 = vector.broadcast %cst_94 : f32 to vector<8x32xf32>
    %302 = arith.addf %301, %300 : vector<8x32xf32>
    %303 = arith.divf %301, %302 : vector<8x32xf32>
    %304 = arith.mulf %295, %277 : vector<8x32xf32>
    %305 = arith.mulf %289, %297 : vector<8x32xf32>
    %306 = arith.addf %304, %305 : vector<8x32xf32>
    %307 = math.tanh %306 : vector<8x32xf32>
    %308 = arith.mulf %303, %307 : vector<8x32xf32>
    %c8_95 = arith.constant 8 : index
    %c0_96 = arith.constant 0 : index
    %309 = vector.load %arg8[%c8_95, %c0_96] : memref<64x32xf32, #tpu.memory_space<vmem>>, vector<8x32xf32>
    tpu.vector_store %arg8[%c8_95, %c0_96], %308 {strides = array<i32>} : memref<64x32xf32, #tpu.memory_space<vmem>>, vector<8x32xf32>,
    %c16_97 = arith.constant 16 : index
    %c0_98 = arith.constant 0 : index
    %310 = vector.load %arg9[%c16_97, %c0_98] : memref<64x128xf32, #tpu.memory_space<vmem>>, vector<8x128xf32>
    %cst_99 = arith.constant dense<0.000000e+00> : vector<8x128xf32>
    %311 = tpu.matmul %308, %249, %cst_99 {dimension_numbers = #tpu.dot_dimension_numbers<[1], [0], [0], [1], [0, 0, 1, 1], [], []>} : vector<8x32xf32>, vector<32x128xf32>, vector<8x128xf32> -> vector<8x128xf32>
    %312 = arith.addf %310, %311 : vector<8x128xf32>
    %313 = vector.extract_strided_slice %312 {offsets = [0, 0], sizes = [8, 32], strides = [1, 1]} : vector<8x128xf32> to vector<8x32xf32>
    %314 = arith.negf %313 : vector<8x32xf32>
    %315 = math.exp %314 : vector<8x32xf32>
    %cst_100 = arith.constant 1.000000e+00 : f32
    %316 = vector.broadcast %cst_100 : f32 to vector<8x32xf32>
    %317 = arith.addf %316, %315 : vector<8x32xf32>
    %318 = arith.divf %316, %317 : vector<8x32xf32>
    %319 = vector.extract_strided_slice %312 {offsets = [0, 32], sizes = [8, 32], strides = [1, 1]} : vector<8x128xf32> to vector<8x32xf32>
    %320 = arith.negf %319 : vector<8x32xf32>
    %321 = math.exp %320 : vector<8x32xf32>
    %cst_101 = arith.constant 1.000000e+00 : f32
    %322 = vector.broadcast %cst_101 : f32 to vector<8x32xf32>
    %323 = arith.addf %322, %321 : vector<8x32xf32>
    %324 = arith.divf %322, %323 : vector<8x32xf32>
    %325 = vector.extract_strided_slice %312 {offsets = [0, 64], sizes = [8, 32], strides = [1, 1]} : vector<8x128xf32> to vector<8x32xf32>
    %326 = math.tanh %325 : vector<8x32xf32>
    %327 = vector.extract_strided_slice %312 {offsets = [0, 96], sizes = [8, 32], strides = [1, 1]} : vector<8x128xf32> to vector<8x32xf32>
    %328 = arith.negf %327 : vector<8x32xf32>
    %329 = math.exp %328 : vector<8x32xf32>
    %cst_102 = arith.constant 1.000000e+00 : f32
    %330 = vector.broadcast %cst_102 : f32 to vector<8x32xf32>
    %331 = arith.addf %330, %329 : vector<8x32xf32>
    %332 = arith.divf %330, %331 : vector<8x32xf32>
    %333 = arith.mulf %324, %306 : vector<8x32xf32>
    %334 = arith.mulf %318, %326 : vector<8x32xf32>
    %335 = arith.addf %333, %334 : vector<8x32xf32>
    %336 = math.tanh %335 : vector<8x32xf32>
    %337 = arith.mulf %332, %336 : vector<8x32xf32>
    %c16_103 = arith.constant 16 : index
    %c0_104 = arith.constant 0 : index
    %338 = vector.load %arg8[%c16_103, %c0_104] : memref<64x32xf32, #tpu.memory_space<vmem>>, vector<8x32xf32>
    tpu.vector_store %arg8[%c16_103, %c0_104], %337 {strides = array<i32>} : memref<64x32xf32, #tpu.memory_space<vmem>>, vector<8x32xf32>,
    %c24_105 = arith.constant 24 : index
    %c0_106 = arith.constant 0 : index
    %339 = vector.load %arg9[%c24_105, %c0_106] : memref<64x128xf32, #tpu.memory_space<vmem>>, vector<8x128xf32>
    %cst_107 = arith.constant dense<0.000000e+00> : vector<8x128xf32>
    %340 = tpu.matmul %337, %249, %cst_107 {dimension_numbers = #tpu.dot_dimension_numbers<[1], [0], [0], [1], [0, 0, 1, 1], [], []>} : vector<8x32xf32>, vector<32x128xf32>, vector<8x128xf32> -> vector<8x128xf32>
    %341 = arith.addf %339, %340 : vector<8x128xf32>
    %342 = vector.extract_strided_slice %341 {offsets = [0, 0], sizes = [8, 32], strides = [1, 1]} : vector<8x128xf32> to vector<8x32xf32>
    %343 = arith.negf %342 : vector<8x32xf32>
    %344 = math.exp %343 : vector<8x32xf32>
    %cst_108 = arith.constant 1.000000e+00 : f32
    %345 = vector.broadcast %cst_108 : f32 to vector<8x32xf32>
    %346 = arith.addf %345, %344 : vector<8x32xf32>
    %347 = arith.divf %345, %346 : vector<8x32xf32>
    %348 = vector.extract_strided_slice %341 {offsets = [0, 32], sizes = [8, 32], strides = [1, 1]} : vector<8x128xf32> to vector<8x32xf32>
    %349 = arith.negf %348 : vector<8x32xf32>
    %350 = math.exp %349 : vector<8x32xf32>
    %cst_109 = arith.constant 1.000000e+00 : f32
    %351 = vector.broadcast %cst_109 : f32 to vector<8x32xf32>
    %352 = arith.addf %351, %350 : vector<8x32xf32>
    %353 = arith.divf %351, %352 : vector<8x32xf32>
    %354 = vector.extract_strided_slice %341 {offsets = [0, 64], sizes = [8, 32], strides = [1, 1]} : vector<8x128xf32> to vector<8x32xf32>
    %355 = math.tanh %354 : vector<8x32xf32>
    %356 = vector.extract_strided_slice %341 {offsets = [0, 96], sizes = [8, 32], strides = [1, 1]} : vector<8x128xf32> to vector<8x32xf32>
    %357 = arith.negf %356 : vector<8x32xf32>
    %358 = math.exp %357 : vector<8x32xf32>
    %cst_110 = arith.constant 1.000000e+00 : f32
    %359 = vector.broadcast %cst_110 : f32 to vector<8x32xf32>
    %360 = arith.addf %359, %358 : vector<8x32xf32>
    %361 = arith.divf %359, %360 : vector<8x32xf32>
    %362 = arith.mulf %353, %335 : vector<8x32xf32>
    %363 = arith.mulf %347, %355 : vector<8x32xf32>
    %364 = arith.addf %362, %363 : vector<8x32xf32>
    %365 = math.tanh %364 : vector<8x32xf32>
    %366 = arith.mulf %361, %365 : vector<8x32xf32>
    %c24_111 = arith.constant 24 : index
    %c0_112 = arith.constant 0 : index
    %367 = vector.load %arg8[%c24_111, %c0_112] : memref<64x32xf32, #tpu.memory_space<vmem>>, vector<8x32xf32>
    tpu.vector_store %arg8[%c24_111, %c0_112], %366 {strides = array<i32>} : memref<64x32xf32, #tpu.memory_space<vmem>>, vector<8x32xf32>,
    %c32_113 = arith.constant 32 : index
    %c0_114 = arith.constant 0 : index
    %368 = vector.load %arg9[%c32_113, %c0_114] : memref<64x128xf32, #tpu.memory_space<vmem>>, vector<8x128xf32>
    %cst_115 = arith.constant dense<0.000000e+00> : vector<8x128xf32>
    %369 = tpu.matmul %366, %249, %cst_115 {dimension_numbers = #tpu.dot_dimension_numbers<[1], [0], [0], [1], [0, 0, 1, 1], [], []>} : vector<8x32xf32>, vector<32x128xf32>, vector<8x128xf32> -> vector<8x128xf32>
    %370 = arith.addf %368, %369 : vector<8x128xf32>
    %371 = vector.extract_strided_slice %370 {offsets = [0, 0], sizes = [8, 32], strides = [1, 1]} : vector<8x128xf32> to vector<8x32xf32>
    %372 = arith.negf %371 : vector<8x32xf32>
    %373 = math.exp %372 : vector<8x32xf32>
    %cst_116 = arith.constant 1.000000e+00 : f32
    %374 = vector.broadcast %cst_116 : f32 to vector<8x32xf32>
    %375 = arith.addf %374, %373 : vector<8x32xf32>
    %376 = arith.divf %374, %375 : vector<8x32xf32>
    %377 = vector.extract_strided_slice %370 {offsets = [0, 32], sizes = [8, 32], strides = [1, 1]} : vector<8x128xf32> to vector<8x32xf32>
    %378 = arith.negf %377 : vector<8x32xf32>
    %379 = math.exp %378 : vector<8x32xf32>
    %cst_117 = arith.constant 1.000000e+00 : f32
    %380 = vector.broadcast %cst_117 : f32 to vector<8x32xf32>
    %381 = arith.addf %380, %379 : vector<8x32xf32>
    %382 = arith.divf %380, %381 : vector<8x32xf32>
    %383 = vector.extract_strided_slice %370 {offsets = [0, 64], sizes = [8, 32], strides = [1, 1]} : vector<8x128xf32> to vector<8x32xf32>
    %384 = math.tanh %383 : vector<8x32xf32>
    %385 = vector.extract_strided_slice %370 {offsets = [0, 96], sizes = [8, 32], strides = [1, 1]} : vector<8x128xf32> to vector<8x32xf32>
    %386 = arith.negf %385 : vector<8x32xf32>
    %387 = math.exp %386 : vector<8x32xf32>
    %cst_118 = arith.constant 1.000000e+00 : f32
    %388 = vector.broadcast %cst_118 : f32 to vector<8x32xf32>
    %389 = arith.addf %388, %387 : vector<8x32xf32>
    %390 = arith.divf %388, %389 : vector<8x32xf32>
    %391 = arith.mulf %382, %364 : vector<8x32xf32>
    %392 = arith.mulf %376, %384 : vector<8x32xf32>
    %393 = arith.addf %391, %392 : vector<8x32xf32>
    %394 = math.tanh %393 : vector<8x32xf32>
    %395 = arith.mulf %390, %394 : vector<8x32xf32>
    %c32_119 = arith.constant 32 : index
    %c0_120 = arith.constant 0 : index
    %396 = vector.load %arg8[%c32_119, %c0_120] : memref<64x32xf32, #tpu.memory_space<vmem>>, vector<8x32xf32>
    tpu.vector_store %arg8[%c32_119, %c0_120], %395 {strides = array<i32>} : memref<64x32xf32, #tpu.memory_space<vmem>>, vector<8x32xf32>,
    %c40_121 = arith.constant 40 : index
    %c0_122 = arith.constant 0 : index
    %397 = vector.load %arg9[%c40_121, %c0_122] : memref<64x128xf32, #tpu.memory_space<vmem>>, vector<8x128xf32>
    %cst_123 = arith.constant dense<0.000000e+00> : vector<8x128xf32>
    %398 = tpu.matmul %395, %249, %cst_123 {dimension_numbers = #tpu.dot_dimension_numbers<[1], [0], [0], [1], [0, 0, 1, 1], [], []>} : vector<8x32xf32>, vector<32x128xf32>, vector<8x128xf32> -> vector<8x128xf32>
    %399 = arith.addf %397, %398 : vector<8x128xf32>
    %400 = vector.extract_strided_slice %399 {offsets = [0, 0], sizes = [8, 32], strides = [1, 1]} : vector<8x128xf32> to vector<8x32xf32>
    %401 = arith.negf %400 : vector<8x32xf32>
    %402 = math.exp %401 : vector<8x32xf32>
    %cst_124 = arith.constant 1.000000e+00 : f32
    %403 = vector.broadcast %cst_124 : f32 to vector<8x32xf32>
    %404 = arith.addf %403, %402 : vector<8x32xf32>
    %405 = arith.divf %403, %404 : vector<8x32xf32>
    %406 = vector.extract_strided_slice %399 {offsets = [0, 32], sizes = [8, 32], strides = [1, 1]} : vector<8x128xf32> to vector<8x32xf32>
    %407 = arith.negf %406 : vector<8x32xf32>
    %408 = math.exp %407 : vector<8x32xf32>
    %cst_125 = arith.constant 1.000000e+00 : f32
    %409 = vector.broadcast %cst_125 : f32 to vector<8x32xf32>
    %410 = arith.addf %409, %408 : vector<8x32xf32>
    %411 = arith.divf %409, %410 : vector<8x32xf32>
    %412 = vector.extract_strided_slice %399 {offsets = [0, 64], sizes = [8, 32], strides = [1, 1]} : vector<8x128xf32> to vector<8x32xf32>
    %413 = math.tanh %412 : vector<8x32xf32>
    %414 = vector.extract_strided_slice %399 {offsets = [0, 96], sizes = [8, 32], strides = [1, 1]} : vector<8x128xf32> to vector<8x32xf32>
    %415 = arith.negf %414 : vector<8x32xf32>
    %416 = math.exp %415 : vector<8x32xf32>
    %cst_126 = arith.constant 1.000000e+00 : f32
    %417 = vector.broadcast %cst_126 : f32 to vector<8x32xf32>
    %418 = arith.addf %417, %416 : vector<8x32xf32>
    %419 = arith.divf %417, %418 : vector<8x32xf32>
    %420 = arith.mulf %411, %393 : vector<8x32xf32>
    %421 = arith.mulf %405, %413 : vector<8x32xf32>
    %422 = arith.addf %420, %421 : vector<8x32xf32>
    %423 = math.tanh %422 : vector<8x32xf32>
    %424 = arith.mulf %419, %423 : vector<8x32xf32>
    %c40_127 = arith.constant 40 : index
    %c0_128 = arith.constant 0 : index
    %425 = vector.load %arg8[%c40_127, %c0_128] : memref<64x32xf32, #tpu.memory_space<vmem>>, vector<8x32xf32>
    tpu.vector_store %arg8[%c40_127, %c0_128], %424 {strides = array<i32>} : memref<64x32xf32, #tpu.memory_space<vmem>>, vector<8x32xf32>,
    %c48_129 = arith.constant 48 : index
    %c0_130 = arith.constant 0 : index
    %426 = vector.load %arg9[%c48_129, %c0_130] : memref<64x128xf32, #tpu.memory_space<vmem>>, vector<8x128xf32>
    %cst_131 = arith.constant dense<0.000000e+00> : vector<8x128xf32>
    %427 = tpu.matmul %424, %249, %cst_131 {dimension_numbers = #tpu.dot_dimension_numbers<[1], [0], [0], [1], [0, 0, 1, 1], [], []>} : vector<8x32xf32>, vector<32x128xf32>, vector<8x128xf32> -> vector<8x128xf32>
    %428 = arith.addf %426, %427 : vector<8x128xf32>
    %429 = vector.extract_strided_slice %428 {offsets = [0, 0], sizes = [8, 32], strides = [1, 1]} : vector<8x128xf32> to vector<8x32xf32>
    %430 = arith.negf %429 : vector<8x32xf32>
    %431 = math.exp %430 : vector<8x32xf32>
    %cst_132 = arith.constant 1.000000e+00 : f32
    %432 = vector.broadcast %cst_132 : f32 to vector<8x32xf32>
    %433 = arith.addf %432, %431 : vector<8x32xf32>
    %434 = arith.divf %432, %433 : vector<8x32xf32>
    %435 = vector.extract_strided_slice %428 {offsets = [0, 32], sizes = [8, 32], strides = [1, 1]} : vector<8x128xf32> to vector<8x32xf32>
    %436 = arith.negf %435 : vector<8x32xf32>
    %437 = math.exp %436 : vector<8x32xf32>
    %cst_133 = arith.constant 1.000000e+00 : f32
    %438 = vector.broadcast %cst_133 : f32 to vector<8x32xf32>
    %439 = arith.addf %438, %437 : vector<8x32xf32>
    %440 = arith.divf %438, %439 : vector<8x32xf32>
    %441 = vector.extract_strided_slice %428 {offsets = [0, 64], sizes = [8, 32], strides = [1, 1]} : vector<8x128xf32> to vector<8x32xf32>
    %442 = math.tanh %441 : vector<8x32xf32>
    %443 = vector.extract_strided_slice %428 {offsets = [0, 96], sizes = [8, 32], strides = [1, 1]} : vector<8x128xf32> to vector<8x32xf32>
    %444 = arith.negf %443 : vector<8x32xf32>
    %445 = math.exp %444 : vector<8x32xf32>
    %cst_134 = arith.constant 1.000000e+00 : f32
    %446 = vector.broadcast %cst_134 : f32 to vector<8x32xf32>
    %447 = arith.addf %446, %445 : vector<8x32xf32>
    %448 = arith.divf %446, %447 : vector<8x32xf32>
    %449 = arith.mulf %440, %422 : vector<8x32xf32>
    %450 = arith.mulf %434, %442 : vector<8x32xf32>
    %451 = arith.addf %449, %450 : vector<8x32xf32>
    %452 = math.tanh %451 : vector<8x32xf32>
    %453 = arith.mulf %448, %452 : vector<8x32xf32>
    %c48_135 = arith.constant 48 : index
    %c0_136 = arith.constant 0 : index
    %454 = vector.load %arg8[%c48_135, %c0_136] : memref<64x32xf32, #tpu.memory_space<vmem>>, vector<8x32xf32>
    tpu.vector_store %arg8[%c48_135, %c0_136], %453 {strides = array<i32>} : memref<64x32xf32, #tpu.memory_space<vmem>>, vector<8x32xf32>,
    %c56_137 = arith.constant 56 : index
    %c0_138 = arith.constant 0 : index
    %455 = vector.load %arg9[%c56_137, %c0_138] : memref<64x128xf32, #tpu.memory_space<vmem>>, vector<8x128xf32>
    %cst_139 = arith.constant dense<0.000000e+00> : vector<8x128xf32>
    %456 = tpu.matmul %453, %249, %cst_139 {dimension_numbers = #tpu.dot_dimension_numbers<[1], [0], [0], [1], [0, 0, 1, 1], [], []>} : vector<8x32xf32>, vector<32x128xf32>, vector<8x128xf32> -> vector<8x128xf32>
    %457 = arith.addf %455, %456 : vector<8x128xf32>
    %458 = vector.extract_strided_slice %457 {offsets = [0, 0], sizes = [8, 32], strides = [1, 1]} : vector<8x128xf32> to vector<8x32xf32>
    %459 = arith.negf %458 : vector<8x32xf32>
    %460 = math.exp %459 : vector<8x32xf32>
    %cst_140 = arith.constant 1.000000e+00 : f32
    %461 = vector.broadcast %cst_140 : f32 to vector<8x32xf32>
    %462 = arith.addf %461, %460 : vector<8x32xf32>
    %463 = arith.divf %461, %462 : vector<8x32xf32>
    %464 = vector.extract_strided_slice %457 {offsets = [0, 32], sizes = [8, 32], strides = [1, 1]} : vector<8x128xf32> to vector<8x32xf32>
    %465 = arith.negf %464 : vector<8x32xf32>
    %466 = math.exp %465 : vector<8x32xf32>
    %cst_141 = arith.constant 1.000000e+00 : f32
    %467 = vector.broadcast %cst_141 : f32 to vector<8x32xf32>
    %468 = arith.addf %467, %466 : vector<8x32xf32>
    %469 = arith.divf %467, %468 : vector<8x32xf32>
    %470 = vector.extract_strided_slice %457 {offsets = [0, 64], sizes = [8, 32], strides = [1, 1]} : vector<8x128xf32> to vector<8x32xf32>
    %471 = math.tanh %470 : vector<8x32xf32>
    %472 = vector.extract_strided_slice %457 {offsets = [0, 96], sizes = [8, 32], strides = [1, 1]} : vector<8x128xf32> to vector<8x32xf32>
    %473 = arith.negf %472 : vector<8x32xf32>
    %474 = math.exp %473 : vector<8x32xf32>
    %cst_142 = arith.constant 1.000000e+00 : f32
    %475 = vector.broadcast %cst_142 : f32 to vector<8x32xf32>
    %476 = arith.addf %475, %474 : vector<8x32xf32>
    %477 = arith.divf %475, %476 : vector<8x32xf32>
    %478 = arith.mulf %469, %451 : vector<8x32xf32>
    %479 = arith.mulf %463, %471 : vector<8x32xf32>
    %480 = arith.addf %478, %479 : vector<8x32xf32>
    %481 = math.tanh %480 : vector<8x32xf32>
    %482 = arith.mulf %477, %481 : vector<8x32xf32>
    %c56_143 = arith.constant 56 : index
    %c0_144 = arith.constant 0 : index
    %483 = vector.load %arg8[%c56_143, %c0_144] : memref<64x32xf32, #tpu.memory_space<vmem>>, vector<8x32xf32>
    tpu.vector_store %arg8[%c56_143, %c0_144], %482 {strides = array<i32>} : memref<64x32xf32, #tpu.memory_space<vmem>>, vector<8x32xf32>,
    return
  }
  func.func @transform_0(%arg0: i32) -> (i32, i32) {
    %c0_i32 = arith.constant 0 : i32
    %c0_i32_0 = arith.constant 0 : i32
    %c0_i32_1 = arith.constant 0 : i32
    return %c0_i32, %c0_i32_0 : i32, i32
  }
  func.func @transform_1(%arg0: i32) -> (i32, i32) {
    %c0_i32 = arith.constant 0 : i32
    %c0_i32_0 = arith.constant 0 : i32
    %c0_i32_1 = arith.constant 0 : i32
    return %c0_i32, %c0_i32_0 : i32, i32
  }
  func.func @transform_2(%arg0: i32) -> (i32, i32) {
    %c0_i32 = arith.constant 0 : i32
    %c0_i32_0 = arith.constant 0 : i32
    %c0_i32_1 = arith.constant 0 : i32
    return %c0_i32, %c0_i32_0 : i32, i32
  }
  func.func @transform_3(%arg0: i32) -> (i32, i32) {
    %c0_i32 = arith.constant 0 : i32
    %c0_i32_0 = arith.constant 0 : i32
    %c0_i32_1 = arith.constant 0 : i32
    return %c0_i32, %c0_i32_0 : i32, i32
  }
  func.func @transform_4(%arg0: i32) -> (i32, i32) {
    %c0_i32 = arith.constant 0 : i32
    %c0_i32_0 = arith.constant 0 : i32
    %c0_i32_1 = arith.constant 0 : i32
    return %c0_i32, %c0_i32_0 : i32, i32
  }
  func.func @transform_5(%arg0: i32) -> (i32, i32) {
    %c0_i32 = arith.constant 0 : i32
    %c0_i32_0 = arith.constant 0 : i32
    %c0_i32_1 = arith.constant 0 : i32
    return %c0_i32, %c0_i32_0 : i32, i32
  }
  func.func @transform_6(%arg0: i32) -> (i32, i32) {
    %c0_i32 = arith.constant 0 : i32
    %c0_i32_0 = arith.constant 0 : i32
    %c0_i32_1 = arith.constant 0 : i32
    return %c0_i32, %c0_i32_0 : i32, i32
  }
  func.func @transform_7(%arg0: i32) -> (i32, i32) {
    %c0_i32 = arith.constant 0 : i32
    %c0_i32_0 = arith.constant 0 : i32
    %c0_i32_1 = arith.constant 0 : i32
    return %c0_i32, %c0_i32_0 : i32, i32
  }
}

</mosaic_0001>

<bundles_post_ra>
// kernel: tpu_custom_call.1
= control target key start
LH: loop header
LB: loop body
LE: loop exit
PB: predicated region body
PF: predicated region fallthrough
CT: control target
= control target key end

     0   :  { %12 = vsyncpa [#allocation5], 0  ;;  %s1497_s27 = smov [#allocation4]   ;;  %s1498_s29 = smov 128   ;;  %s1859_s0 = inlined_call_operand.vmem [shape: f32[64,16], index: 0, kind: input, shape index: {}]   ;;  %s1860_s1 = inlined_call_operand.vmem [shape: f32[16,128], index: 1, kind: input, shape index: {}]   ;;  %s1861_s2 = inlined_call_operand.vmem [shape: f32[1,128], index: 2, kind: input, shape index: {}]   ;;  %s1862_s3 = inlined_call_operand.vmem [shape: f32[32,128], index: 3, kind: input, shape index: {}]   ;;  %s1863_s4 = inlined_call_operand.vmem [shape: f32[32,128], index: 4, kind: input, shape index: {}]   ;;  %s1864_s5 = inlined_call_operand.vmem [shape: f32[1,128], index: 5, kind: input, shape index: {}]   ;;  %s1865_s6 = inlined_call_operand.hbm [shape: f32[32,128], index: 6, kind: input, shape index: {}]   ;;  %s1866_s7 = inlined_call_operand.vmem [shape: f32[64,32], index: 7, kind: output, shape index: {}]  }
   0x1   :  { %s29_s26 = sshll.u32 %s1865_s6, 4  ;;  %s31_s28 = sshll.u32 %s1497_s27, 4  ;;  %s30_s26 = int_to_ptr.hbm [resolvable:$true] %s29_s26  ;;  %s32_s28 = int_to_ptr.vmem [resolvable:$true] %s31_s28 }
   0x2   :  { %s1499_s30 = smov 8  }
   0x3   :  { %37 = dma.hbm_to_vmem [thread:$0]  %s30_s26, 512, %s32_s28, [#allocation5], %s1498_s29, %s1498_s29, %s1499_s30  }
   0x4   :  { %1495 = dma.done.wait [#allocation5], 512  }
   0x5   :  { %1496 = vsyncadd [#allocation5], 4294966784  ;;  %v1549_v0 = vld [vmem:[%s1862_s3 + $0x18] sm:$0xff]  ;;  %v51_v1 = vld [vmem:[%s1860_s1 + $0x8] sm:$0xff]  ;;  %vm56_vm0 = vcmask 130048   ;;  %v1500_v7 = vmov 0.0  }
   0x6   :  { %v1557_v2 = vld [vmem:[%s1862_s3 + $0x10] sm:$0xff]  ;;  %151 = vmatpush.msra.mxu1 %v1549_v0  ;;  %95 = vmatpush.msra.mxu0 %v51_v1  ;;  %v50_v3 = vld [vmem:[%s1860_s1] sm:$0xff]  ;;  %v1569_v5 = vld [vmem:[%s1862_s3 + $0x8] sm:$0xff]  ;;  %s1501_s21 = smov 64   ;;  %s1502_s22 = smov 32   ;;  %vm135_vm5 = vcmask 261120  }
   0x7   :  { %v42_v4 = vld [vmem:[%s1859_s0] sm:$0xff]  ;;  %217 = vmatpush.msra.mxu2 %v1549_v0  ;;  %v675_v35 = vld [vmem:[%s1863_s4 + $0x18] sm:$0xff]  ;;  %v674_v36 = vld [vmem:[%s1863_s4 + $0x10] sm:$0xff] }
   0x8   :  { %152 = vmatpush.msra.mxu1 %v1557_v2  ;;  %96 = vmatpush.msra.mxu0 %v50_v3  ;;  %v1577_v6 = vld [vmem:[%s1862_s3] sm:$0xff]  ;;  %v43_v37 = vld [vmem:[%s1859_s0 + $0x8] sm:$0xff] }
   0x9   :  { %1288 = vmatmul.msk.f32.vlgmr.msra.gmra.mxu0 %vm56_vm0, %v42_v4  ;;  %218 = vmatpush.msra.mxu2 %v1557_v2  ;;  %v1600_v8 = vld [vmem:[%s1861_s2] ss:$0 sm:$0xff]  ;;  %v673_v38 = vld [vmem:[%s1863_s4 + $0x8] sm:$0xff]  ;;  %v44_v4 = vld [vmem:[%s1859_s0 + $0x10] sm:$0xff] }
   0xa   :  { %153 = vmatpush.msra.mxu1 %v1569_v5  ;;  %716 = vmatpush.msra.mxu3 %v675_v35  ;;  %v672_v39 = vld [vmem:[%s1863_s4] sm:$0xff] }
   0xb   :  { %219 = vmatpush.msra.mxu2 %v1569_v5 }
   0xc   :  { %154 = vmatpush.msra.mxu1 %v1577_v6  ;;  %717 = vmatpush.msra.mxu3 %v674_v36 }
   0xd   :  { %155 = vmatmul.f32.vlgmr.msra.gmra.mxu1 %v1500_v7  ;;  %220 = vmatpush.msra.mxu2 %v1577_v6 }
   0xe   :  { %283 = vmatpush.msrb.mxu1 %v1549_v0  ;;  %718 = vmatpush.msra.mxu3 %v673_v38 }
   0xf   :  { %415 = vmatpush.msrb.mxu2 %v1549_v0 }
  0x10   :  { %284 = vmatpush.msrb.mxu1 %v1557_v2  ;;  %719 = vmatpush.msra.mxu3 %v672_v39 }
  0x11   :  { %416 = vmatpush.msrb.mxu2 %v1557_v2  ;;  %1289 = vmatmul.msk.f32.gmra.mxu0 %vm56_vm0, %v43_v37  ;;  %v45_v37 = vld [vmem:[%s1859_s0 + $0x18] sm:$0xff] }
  0x12   :  { %285 = vmatpush.msrb.mxu1 %v1569_v5 }
  0x13   :  { %417 = vmatpush.msrb.mxu2 %v1569_v5 }
  0x14   :  { %286 = vmatpush.msrb.mxu1 %v1577_v6 }
  0x15   :  { %418 = vmatpush.msrb.mxu2 %v1577_v6 }
  0x16   :  { %349 = vmatpush.msra.mxu1 %v1549_v0 }
  0x18   :  { %350 = vmatpush.msra.mxu1 %v1557_v2 }
  0x19   :  { %1290 = vmatmul.msk.f32.gmra.mxu0 %vm56_vm0, %v44_v4 }
  0x1a   :  { %351 = vmatpush.msra.mxu1 %v1569_v5 }
  0x1c   :  { %352 = vmatpush.msra.mxu1 %v1577_v6 }
  0x21   :  { %1291 = vmatmul.msk.f32.gmra.mxu0 %vm56_vm0, %v45_v37 }
  0x86   :  { %v98_v9 = vpop.f32.mrf.mxu0 }
  0x87   :  { %v99_v10 = vadd.f32 %v1600_v8, %v98_v9 }
  0x8a   :  { %v156_v11 = vpop.f32.mrf.mxu1 }
  0x8b   :  { %v159_v12 = vadd.f32 %v156_v11, %v99_v10 }
  0x8d   :  { %1342 = vtanh.f32 %v159_v12  ;;  %v1296_v14 = vmul.f32 -1.442695, %v159_v12 }
  0x8e   :  { %v101_v42 = vpop.f32.mrf.mxu0 }
  0x8f   :  { %1344 = vpow2.f32 %v1296_v14  ;;  %v102_v43 = vadd.f32 %v1600_v8, %v101_v42 }
  0x93   :  { %v1343_v13 = vpop.eup %1342 }
  0x94   :  { %182 = vrot.lane.b32.xlu0 %v1343_v13, %s1501_s21 }
  0x95   :  { %v1345_v15 = vpop.eup %1344 }
  0x96   :  { %v163_v16 = vadd.f32 1.0, %v1345_v15  ;;  %v104_v13 = vpop.f32.mrf.mxu0 }
  0x97   :  { %v105_v14 = vadd.f32 %v1600_v8, %v104_v13 }
  0x98   :  { %1346 = vrcp.f32 %v163_v16  ;;  %v175_v22 = vand.u32 2147483648, %v163_v16  ;;  %vm169_vm2 = vweird.f32 %v163_v16  ;;  %v173_v23 = vand.u32 2147483647, %v163_v16 }
  0x9a   :  { %v176_v25 = vor.u32 1.1754944e-38, %v175_v22  ;;  %vm174_vm4 = vcmp.eq.f32.partialorder %v173_v23, 8.507059e+37 }
  0x9e   :  { %v1347_v17 = vpop.eup %1346  ;;  %v107_v42 = vpop.f32.mrf.mxu0 }
  0x9f   :  { %v165_v18 = vmul.f32 %v1347_v17, %v163_v16  ;;  %vm170_vm1 = vweird.f32 %v1347_v17 }
  0xa0   :  { %vm171_vm3 = vmor %vm169_vm2, %vm170_vm1 }
  0xa1   :  { %v166_v19 = vsub.f32 1.0, %v165_v18 }
  0xa3   :  { %v167_v20 = vmul.f32 %v1347_v17, %v166_v19 }
  0xa5   :  { %v168_v21 = vadd.f32 %v1347_v17, %v167_v20 }
  0xa7   :  { %v172_v24 = vsel %vm171_vm3, %v1347_v17, %v168_v21 }
  0xa8   :  { %v177_v27 = vsel %vm174_vm4, %v176_v25, %v172_v24 }
  0xa9   :  { %v180_v29 = vmul.f32 0.0, %v177_v27 }
 0x106   :  { %v183_v26 = vpop.permute.xlu0 %182 }
 0x107   :  { %v185_v28 = vmul.f32 %v183_v26, %v177_v27 }
 0x109   :  { %187 = vrot.lane.b32.xlu0 %v185_v28, %s1502_s22 }
 0x17b   :  { %v188_v30 = vpop.permute.xlu0 %187 }
 0x17c   :  { %v190_v31 = vadd.f32 %v188_v30, %v180_v29 }
 0x17e   :  { %1348 = vtanh.f32 %v190_v31 }
 0x184   :  { %v1349_v32 = vpop.eup %1348 }
 0x185   :  { %193 = vrot.lane.b32.xlu1 %v1349_v32, %s1501_s21 }
 0x1f7   :  { %v194_v33 = vpop.permute.xlu1 %193 }
 0x1f8   :  { %v196_v34 = vmul.f32 %v194_v33, %v177_v27 }
 0x1fa   :  { %198 = vrot.lane.b32.xlu1 %v196_v34, %s1502_s22 }
 0x26c   :  { %v199_v40 = vpop.permute.xlu1 %198 }
 0x26d   :  { %201 = vst.msk [vmem:[#allocation3] sm:$0xff] %vm135_vm5, %v199_v40  ;;  %1297 = vmatmul.msk.f32.vlgmr.msra.gmra.mxu2 %vm135_vm5, %v199_v40 }
 0x26e   :  { %481 = vmatpush.msra.mxu2 %v1549_v0 }
 0x270   :  { %482 = vmatpush.msra.mxu2 %v1557_v2 }
 0x272   :  { %483 = vmatpush.msra.mxu2 %v1569_v5 }
 0x274   :  { %v664_v41 = vld [vmem:[#allocation3] sm:$0xff]  ;;  %484 = vmatpush.msra.mxu2 %v1577_v6 }
 0x275   :  { %1311 = vmatmul.msk.f32.vlgmr.msra.gmra.mxu3 %vm135_vm5, %v664_v41 }
 0x2f0   :  { %v222_v44 = vpop.f32.mrf.mxu2 }
 0x2f1   :  { %v225_v45 = vadd.f32 %v222_v44, %v102_v43  ;;  %v108_v43 = vadd.f32 %v1600_v8, %v107_v42 }
 0x2f3   :  { %1350 = vtanh.f32 %v225_v45  ;;  %v1298_v47 = vmul.f32 -1.442695, %v225_v45 }
 0x2f5   :  { %1352 = vpow2.f32 %v1298_v47 }
 0x2f9   :  { %v1351_v46 = vpop.eup %1350 }
 0x2fa   :  { %248 = vrot.lane.b32.xlu2 %v1351_v46, %s1501_s21 }
 0x2fb   :  { %v1353_v48 = vpop.eup %1352 }
 0x2fc   :  { %v229_v49 = vadd.f32 1.0, %v1353_v48 }
 0x2fe   :  { %1354 = vrcp.f32 %v229_v49  ;;  %v241_v55 = vand.u32 2147483648, %v229_v49  ;;  %vm235_vm7 = vweird.f32 %v229_v49  ;;  %v239_v56 = vand.u32 2147483647, %v229_v49 }
 0x300   :  { %v242_v58 = vor.u32 1.1754944e-38, %v241_v55  ;;  %vm240_vm9 = vcmp.eq.f32.partialorder %v239_v56, 8.507059e+37 }
 0x304   :  { %v1355_v50 = vpop.eup %1354 }
 0x305   :  { %v231_v51 = vmul.f32 %v1355_v50, %v229_v49  ;;  %vm236_vm6 = vweird.f32 %v1355_v50 }
 0x306   :  { %vm237_vm8 = vmor %vm235_vm7, %vm236_vm6 }
 0x307   :  { %v232_v52 = vsub.f32 1.0, %v231_v51 }
 0x309   :  { %v233_v53 = vmul.f32 %v1355_v50, %v232_v52 }
 0x30b   :  { %v234_v54 = vadd.f32 %v1355_v50, %v233_v53 }
 0x30d   :  { %v238_v57 = vsel %vm237_vm8, %v1355_v50, %v234_v54 }
 0x30e   :  { %v243_v60 = vsel %vm240_vm9, %v242_v58, %v238_v57 }
 0x30f   :  { %v246_v62 = vmul.f32 %v243_v60, %v190_v31 }
 0x354   :  { %v249_v59 = vpop.permute.xlu2 %248 }
 0x355   :  { %v251_v61 = vmul.f32 %v249_v59, %v243_v60 }
 0x357   :  { %253 = vrot.lane.b32.xlu2 %v251_v61, %s1502_s22 }
 0x3b1   :  { %v254_v63 = vpop.permute.xlu2 %253 }
 0x3b2   :  { %v256_v1 = vadd.f32 %v254_v63, %v246_v62 }
 0x3b4   :  { %1356 = vtanh.f32 %v256_v1 }
 0x3ba   :  { %v1357_v3 = vpop.eup %1356 }
 0x3bb   :  { %259 = vrot.lane.b32.xlu0 %v1357_v3, %s1501_s21 }
 0x42d   :  { %v260_v9 = vpop.permute.xlu0 %259 }
 0x42e   :  { %v262_v10 = vmul.f32 %v260_v9, %v243_v60 }
 0x430   :  { %264 = vrot.lane.b32.xlu1 %v262_v10, %s1502_s22  ;;  %v46_v10 = vld [vmem:[%s1859_s0 + $0x20] sm:$0xff] }
 0x431   :  { %1292 = vmatmul.msk.f32.gmra.mxu0 %vm56_vm0, %v46_v10  ;;  %v1708_v10 = vld [vmem:[#allocation4] sm:$0xff] }
 0x4a2   :  { %v265_v11 = vpop.permute.xlu1 %264 }
 0x4a3   :  { %267 = vst.msk [vmem:[#allocation3 + $0x8] sm:$0xff] %vm135_vm5, %v265_v11  ;;  %1299 = vmatmul.msk.f32.vlgmr.msrb.gmra.mxu1 %vm135_vm5, %v265_v11 }
 0x4a4   :  { %547 = vmatpush.msrb.mxu1 %v1549_v0 }
 0x4a6   :  { %548 = vmatpush.msrb.mxu1 %v1557_v2 }
 0x4a8   :  { %549 = vmatpush.msrb.mxu1 %v1569_v5 }
 0x4aa   :  { %v665_v12 = vld [vmem:[#allocation3 + $0x8] sm:$0xff]  ;;  %550 = vmatpush.msrb.mxu1 %v1577_v6 }
 0x4ab   :  { %1312 = vmatmul.msk.f32.gmra.mxu3 %vm135_vm5, %v665_v12 }
 0x4ae   :  { %v110_v13 = vpop.f32.mrf.mxu0 }
 0x520   :  { %v288_v15 = vpop.f32.mrf.mxu1 }
 0x521   :  { %v291_v16 = vadd.f32 %v288_v15, %v105_v14  ;;  %v111_v14 = vadd.f32 %v1600_v8, %v110_v13 }
 0x523   :  { %1358 = vtanh.f32 %v291_v16  ;;  %v1300_v18 = vmul.f32 -1.442695, %v291_v16 }
 0x525   :  { %1360 = vpow2.f32 %v1300_v18 }
 0x529   :  { %v1359_v17 = vpop.eup %1358 }
 0x52a   :  { %314 = vrot.lane.b32.xlu2 %v1359_v17, %s1501_s21 }
 0x52b   :  { %v1361_v19 = vpop.eup %1360 }
 0x52c   :  { %v295_v20 = vadd.f32 1.0, %v1361_v19 }
 0x52e   :  { %1362 = vrcp.f32 %v295_v20  ;;  %v307_v26 = vand.u32 2147483648, %v295_v20  ;;  %vm301_vm11 = vweird.f32 %v295_v20  ;;  %v305_v27 = vand.u32 2147483647, %v295_v20 }
 0x530   :  { %v308_v29 = vor.u32 1.1754944e-38, %v307_v26  ;;  %vm306_vm13 = vcmp.eq.f32.partialorder %v305_v27, 8.507059e+37 }
 0x534   :  { %v1363_v21 = vpop.eup %1362 }
 0x535   :  { %v297_v22 = vmul.f32 %v1363_v21, %v295_v20  ;;  %vm302_vm10 = vweird.f32 %v1363_v21 }
 0x536   :  { %vm303_vm12 = vmor %vm301_vm11, %vm302_vm10 }
 0x537   :  { %v298_v23 = vsub.f32 1.0, %v297_v22 }
 0x539   :  { %v299_v24 = vmul.f32 %v1363_v21, %v298_v23 }
 0x53b   :  { %v300_v25 = vadd.f32 %v1363_v21, %v299_v24 }
 0x53d   :  { %v304_v28 = vsel %vm303_vm12, %v1363_v21, %v300_v25 }
 0x53e   :  { %v309_v31 = vsel %vm306_vm13, %v308_v29, %v304_v28 }
 0x53f   :  { %v312_v33 = vmul.f32 %v309_v31, %v256_v1 }
 0x584   :  { %v315_v30 = vpop.permute.xlu2 %314 }
 0x585   :  { %v317_v32 = vmul.f32 %v315_v30, %v309_v31 }
 0x587   :  { %319 = vrot.lane.b32.xlu0 %v317_v32, %s1502_s22 }
 0x5f9   :  { %v320_v34 = vpop.permute.xlu0 %319 }
 0x5fa   :  { %v322_v35 = vadd.f32 %v320_v34, %v312_v33 }
 0x5fc   :  { %1364 = vtanh.f32 %v322_v35 }
 0x602   :  { %v1365_v36 = vpop.eup %1364 }
 0x603   :  { %325 = vrot.lane.b32.xlu1 %v1365_v36, %s1501_s21 }
 0x675   :  { %v326_v38 = vpop.permute.xlu1 %325 }
 0x676   :  { %v328_v39 = vmul.f32 %v326_v38, %v309_v31 }
 0x678   :  { %330 = vrot.lane.b32.xlu2 %v328_v39, %s1502_s22 }
 0x6d2   :  { %v331_v40 = vpop.permute.xlu2 %330 }
 0x6d3   :  { %333 = vst.msk [vmem:[#allocation3 + $0x10] sm:$0xff] %vm135_vm5, %v331_v40  ;;  %1301 = vmatmul.msk.f32.vlgmr.msra.gmra.mxu1 %vm135_vm5, %v331_v40 }
 0x6da   :  { %v666_v41 = vld [vmem:[#allocation3 + $0x10] sm:$0xff] }
 0x6db   :  { %1313 = vmatmul.msk.f32.gmra.mxu3 %vm135_vm5, %v666_v41 }
 0x750   :  { %v354_v44 = vpop.f32.mrf.mxu1 }
 0x751   :  { %v357_v45 = vadd.f32 %v354_v44, %v108_v43 }
 0x753   :  { %1366 = vtanh.f32 %v357_v45  ;;  %v1302_v47 = vmul.f32 -1.442695, %v357_v45 }
 0x755   :  { %1368 = vpow2.f32 %v1302_v47 }
 0x759   :  { %v1367_v46 = vpop.eup %1366 }
 0x75a   :  { %380 = vrot.lane.b32.xlu0 %v1367_v46, %s1501_s21 }
 0x75b   :  { %v1369_v48 = vpop.eup %1368 }
 0x75c   :  { %v361_v49 = vadd.f32 1.0, %v1369_v48 }
 0x75e   :  { %1370 = vrcp.f32 %v361_v49  ;;  %v373_v55 = vand.u32 2147483648, %v361_v49  ;;  %vm367_vm15 = vweird.f32 %v361_v49  ;;  %v371_v56 = vand.u32 2147483647, %v361_v49 }
 0x760   :  { %v374_v58 = vor.u32 1.1754944e-38, %v373_v55  ;;  %vm372_vm2 = vcmp.eq.f32.partialorder %v371_v56, 8.507059e+37 }
 0x764   :  { %v1371_v50 = vpop.eup %1370 }
 0x765   :  { %v363_v51 = vmul.f32 %v1371_v50, %v361_v49  ;;  %vm368_vm14 = vweird.f32 %v1371_v50 }
 0x766   :  { %vm369_vm1 = vmor %vm367_vm15, %vm368_vm14 }
 0x767   :  { %v364_v52 = vsub.f32 1.0, %v363_v51 }
 0x769   :  { %v365_v53 = vmul.f32 %v1371_v50, %v364_v52 }
 0x76b   :  { %v366_v54 = vadd.f32 %v1371_v50, %v365_v53 }
 0x76d   :  { %v370_v57 = vsel %vm369_vm1, %v1371_v50, %v366_v54 }
 0x76e   :  { %v375_v60 = vsel %vm372_vm2, %v374_v58, %v370_v57 }
 0x76f   :  { %v378_v62 = vmul.f32 %v375_v60, %v322_v35  ;;  %v47_v35 = vld [vmem:[%s1859_s0 + $0x28] sm:$0xff] }
 0x770   :  { %1293 = vmatmul.msk.f32.gmra.mxu0 %vm56_vm0, %v47_v35 }
 0x7cc   :  { %v381_v59 = vpop.permute.xlu0 %380 }
 0x7cd   :  { %v383_v61 = vmul.f32 %v381_v59, %v375_v60 }
 0x7cf   :  { %385 = vrot.lane.b32.xlu1 %v383_v61, %s1502_s22 }
 0x7ed   :  { %v113_v38 = vpop.f32.mrf.mxu0 }
 0x7ee   :  { %v114_v39 = vadd.f32 %v1600_v8, %v113_v38 }
 0x841   :  { %v386_v63 = vpop.permute.xlu1 %385 }
 0x842   :  { %v388_v1 = vadd.f32 %v386_v63, %v378_v62  ;;  %v48_v62 = vld [vmem:[%s1859_s0 + $0x30] sm:$0xff] }
 0x843   :  { %1294 = vmatmul.msk.f32.gmra.mxu0 %vm56_vm0, %v48_v62 }
 0x844   :  { %1372 = vtanh.f32 %v388_v1 }
 0x84a   :  { %v1373_v3 = vpop.eup %1372 }
 0x84b   :  { %391 = vrot.lane.b32.xlu2 %v1373_v3, %s1501_s21  ;;  %v1698_v3 = vld [vmem:[#allocation4 + $0x18] sm:$0xff] }
 0x84c   :  { %770 = vmatpush.msra.mxu1 %v1698_v3 }
 0x8a5   :  { %v392_v4 = vpop.permute.xlu2 %391 }
 0x8a6   :  { %v394_v9 = vmul.f32 %v392_v4, %v375_v60  ;;  %v1700_v4 = vld [vmem:[#allocation4 + $0x10] sm:$0xff] }
 0x8a7   :  { %771 = vmatpush.msra.mxu1 %v1700_v4 }
 0x8a8   :  { %396 = vrot.lane.b32.xlu0 %v394_v9, %s1502_s22  ;;  %v1704_v9 = vld [vmem:[#allocation4 + $0x8] sm:$0xff] }
 0x8a9   :  { %772 = vmatpush.msra.mxu1 %v1704_v9 }
 0x8ab   :  { %773 = vmatpush.msra.mxu1 %v1708_v10 }
 0x8c0   :  { %v116_v13 = vpop.f32.mrf.mxu0 }
 0x91a   :  { %v397_v11 = vpop.permute.xlu0 %396 }
 0x91b   :  { %399 = vst.msk [vmem:[#allocation3 + $0x18] sm:$0xff] %vm135_vm5, %v397_v11  ;;  %1303 = vmatmul.msk.f32.vlgmr.msrb.gmra.mxu2 %vm135_vm5, %v397_v11 }
 0x91c   :  { %613 = vmatpush.msrb.mxu2 %v1549_v0 }
 0x91e   :  { %614 = vmatpush.msrb.mxu2 %v1557_v2 }
 0x920   :  { %615 = vmatpush.msrb.mxu2 %v1569_v5 }
 0x922   :  { %v667_v12 = vld [vmem:[#allocation3 + $0x18] sm:$0xff]  ;;  %616 = vmatpush.msrb.mxu2 %v1577_v6 }
 0x923   :  { %1314 = vmatmul.msk.f32.gmra.mxu3 %vm135_vm5, %v667_v12 }
 0x99e   :  { %v420_v15 = vpop.f32.mrf.mxu2 }
 0x99f   :  { %v423_v16 = vadd.f32 %v420_v15, %v111_v14  ;;  %v117_v14 = vadd.f32 %v1600_v8, %v116_v13 }
 0x9a1   :  { %1374 = vtanh.f32 %v423_v16  ;;  %v1304_v18 = vmul.f32 -1.442695, %v423_v16 }
 0x9a3   :  { %1376 = vpow2.f32 %v1304_v18 }
 0x9a7   :  { %v1375_v17 = vpop.eup %1374 }
 0x9a8   :  { %446 = vrot.lane.b32.xlu1 %v1375_v17, %s1501_s21  ;;  %v1730_v17 = vld [vmem:[%s1864_s5] ss:$0 sm:$0xff] }
 0x9a9   :  { %v1377_v0 = vpop.eup %1376 }
 0x9aa   :  { %v427_v2 = vadd.f32 1.0, %v1377_v0 }
 0x9ac   :  { %1378 = vrcp.f32 %v427_v2  ;;  %v439_v22 = vand.u32 2147483648, %v427_v2  ;;  %vm433_vm4 = vweird.f32 %v427_v2  ;;  %v437_v23 = vand.u32 2147483647, %v427_v2 }
 0x9ae   :  { %v440_v25 = vor.u32 1.1754944e-38, %v439_v22  ;;  %vm438_vm7 = vcmp.eq.f32.partialorder %v437_v23, 8.507059e+37 }
 0x9b2   :  { %v1379_v5 = vpop.eup %1378 }
 0x9b3   :  { %v429_v19 = vmul.f32 %v1379_v5, %v427_v2  ;;  %vm434_vm3 = vweird.f32 %v1379_v5 }
 0x9b4   :  { %vm435_vm6 = vmor %vm433_vm4, %vm434_vm3 }
 0x9b5   :  { %v430_v20 = vsub.f32 1.0, %v429_v19 }
 0x9b7   :  { %v431_v6 = vmul.f32 %v1379_v5, %v430_v20 }
 0x9b9   :  { %v432_v21 = vadd.f32 %v1379_v5, %v431_v6 }
 0x9bb   :  { %v436_v24 = vsel %vm435_vm6, %v1379_v5, %v432_v21 }
 0x9bc   :  { %v441_v27 = vsel %vm438_vm7, %v440_v25, %v436_v24 }
 0x9bd   :  { %v444_v29 = vmul.f32 %v441_v27, %v388_v1 }
 0xa1a   :  { %v447_v26 = vpop.permute.xlu1 %446 }
 0xa1b   :  { %v449_v28 = vmul.f32 %v447_v26, %v441_v27 }
 0xa1d   :  { %451 = vrot.lane.b32.xlu2 %v449_v28, %s1502_s22 }
 0xa77   :  { %v452_v30 = vpop.permute.xlu2 %451 }
 0xa78   :  { %v454_v31 = vadd.f32 %v452_v30, %v444_v29 }
 0xa7a   :  { %1380 = vtanh.f32 %v454_v31 }
 0xa80   :  { %v1381_v32 = vpop.eup %1380 }
 0xa81   :  { %457 = vrot.lane.b32.xlu0 %v1381_v32, %s1501_s21 }
 0xaf3   :  { %v458_v33 = vpop.permute.xlu0 %457 }
 0xaf4   :  { %v460_v34 = vmul.f32 %v458_v33, %v441_v27 }
 0xaf6   :  { %462 = vrot.lane.b32.xlu1 %v460_v34, %s1502_s22 }
 0xb68   :  { %v463_v36 = vpop.permute.xlu1 %462 }
 0xb69   :  { %465 = vst.msk [vmem:[#allocation3 + $0x20] sm:$0xff] %vm135_vm5, %v463_v36  ;;  %1305 = vmatmul.msk.f32.vlgmr.msra.gmra.mxu2 %vm135_vm5, %v463_v36 }
 0xb6a   :  { %836 = vmatpush.msra.mxu2 %v1698_v3 }
 0xb6c   :  { %837 = vmatpush.msra.mxu2 %v1700_v4 }
 0xb6e   :  { %838 = vmatpush.msra.mxu2 %v1704_v9 }
 0xb70   :  { %v668_v37 = vld [vmem:[#allocation3 + $0x20] sm:$0xff]  ;;  %839 = vmatpush.msra.mxu2 %v1708_v10 }
 0xb71   :  { %1315 = vmatmul.msk.f32.gmra.mxu3 %vm135_vm5, %v668_v37 }
 0xbec   :  { %v486_v40 = vpop.f32.mrf.mxu2 }
 0xbed   :  { %v489_v41 = vadd.f32 %v486_v40, %v114_v39 }
 0xbef   :  { %1382 = vtanh.f32 %v489_v41  ;;  %v1306_v43 = vmul.f32 -1.442695, %v489_v41 }
 0xbf1   :  { %1384 = vpow2.f32 %v1306_v43 }
 0xbf5   :  { %v1383_v42 = vpop.eup %1382 }
 0xbf6   :  { %512 = vrot.lane.b32.xlu2 %v1383_v42, %s1501_s21 }
 0xbf7   :  { %v1385_v44 = vpop.eup %1384 }
 0xbf8   :  { %v493_v45 = vadd.f32 1.0, %v1385_v44 }
 0xbfa   :  { %1386 = vrcp.f32 %v493_v45  ;;  %v505_v51 = vand.u32 2147483648, %v493_v45  ;;  %vm499_vm9 = vweird.f32 %v493_v45  ;;  %v503_v52 = vand.u32 2147483647, %v493_v45 }
 0xbfc   :  { %v506_v54 = vor.u32 1.1754944e-38, %v505_v51  ;;  %vm504_vm11 = vcmp.eq.f32.partialorder %v503_v52, 8.507059e+37 }
 0xc00   :  { %v1387_v46 = vpop.eup %1386 }
 0xc01   :  { %v495_v47 = vmul.f32 %v1387_v46, %v493_v45  ;;  %vm500_vm8 = vweird.f32 %v1387_v46 }
 0xc02   :  { %vm501_vm10 = vmor %vm499_vm9, %vm500_vm8 }
 0xc03   :  { %v496_v48 = vsub.f32 1.0, %v495_v47 }
 0xc05   :  { %v497_v49 = vmul.f32 %v1387_v46, %v496_v48 }
 0xc07   :  { %v498_v50 = vadd.f32 %v1387_v46, %v497_v49 }
 0xc09   :  { %v502_v53 = vsel %vm501_vm10, %v1387_v46, %v498_v50 }
 0xc0a   :  { %v507_v56 = vsel %vm504_vm11, %v506_v54, %v502_v53 }
 0xc0b   :  { %v510_v58 = vmul.f32 %v507_v56, %v454_v31 }
 0xc50   :  { %v513_v55 = vpop.permute.xlu2 %512 }
 0xc51   :  { %v515_v57 = vmul.f32 %v513_v55, %v507_v56 }
 0xc53   :  { %517 = vrot.lane.b32.xlu0 %v515_v57, %s1502_s22 }
 0xcc5   :  { %v518_v59 = vpop.permute.xlu0 %517 }
 0xcc6   :  { %v1689_v60 = vadd.f32 %v518_v59, %v510_v58 }
 0xcc8   :  { %1388 = vtanh.f32 %v1689_v60 }
 0xcce   :  { %v1389_v61 = vpop.eup %1388 }
 0xccf   :  { %523 = vrot.lane.b32.xlu1 %v1389_v61, %s1501_s21 }
 0xd41   :  { %v524_v63 = vpop.permute.xlu1 %523 }
 0xd42   :  { %v526_v1 = vmul.f32 %v524_v63, %v507_v56 }
 0xd44   :  { %528 = vrot.lane.b32.xlu2 %v526_v1, %s1502_s22 }
 0xd9e   :  { %v529_v11 = vpop.permute.xlu2 %528 }
 0xd9f   :  { %531 = vst.msk [vmem:[#allocation3 + $0x28] sm:$0xff] %vm135_vm5, %v529_v11  ;;  %1307 = vmatmul.msk.f32.vlgmr.msrb.gmra.mxu1 %vm135_vm5, %v529_v11 }
 0xda0   :  { %902 = vmatpush.msrb.mxu1 %v1698_v3 }
 0xda2   :  { %903 = vmatpush.msrb.mxu1 %v1700_v4 }
 0xda4   :  { %904 = vmatpush.msrb.mxu1 %v1704_v9 }
 0xda6   :  { %v669_v12 = vld [vmem:[#allocation3 + $0x28] sm:$0xff]  ;;  %905 = vmatpush.msrb.mxu1 %v1708_v10 }
 0xda7   :  { %1316 = vmatmul.msk.f32.gmra.mxu3 %vm135_vm5, %v669_v12  ;;  %774 = vmatmul.f32.vlgmr.msra.gmra.mxu1 %v1500_v7  ;;  %v721_v7 = vpop.f32.mrf.mxu3 }
 0xda8   :  { %1034 = vmatpush.msra.mxu1 %v1698_v3  ;;  %v722_v18 = vadd.f32 %v1730_v17, %v721_v7 }
 0xdaa   :  { %1035 = vmatpush.msra.mxu1 %v1700_v4 }
 0xdac   :  { %1036 = vmatpush.msra.mxu1 %v1704_v9 }
 0xdae   :  { %1037 = vmatpush.msra.mxu1 %v1708_v10 }
 0xdaf   :  { %v724_v11 = vpop.f32.mrf.mxu3 }
 0xdb0   :  { %v725_v12 = vadd.f32 %v1730_v17, %v724_v11 }
 0xe1c   :  { %v552_v15 = vpop.f32.mrf.mxu1 }
 0xe1d   :  { %v555_v16 = vadd.f32 %v552_v15, %v117_v14 }
 0xe1f   :  { %1390 = vtanh.f32 %v555_v16  ;;  %v1308_v8 = vmul.f32 -1.442695, %v555_v16 }
 0xe24   :  { %v775_v0 = vpop.f32.mrf.mxu1 }
 0xe25   :  { %v1391_v2 = vpop.eup %1390  ;;  %v778_v5 = vadd.f32 %v775_v0, %v722_v18 }
 0xe26   :  { %578 = vrot.lane.b32.xlu0 %v1391_v2, %s1501_s21 }
 0xe27   :  { %1392 = vtanh.f32 %v778_v5  ;;  %v1319_v20 = vmul.f32 -1.442695, %v778_v5 }
 0xe28   :  { %1394 = vpow2.f32 %v1308_v8 }
 0xe29   :  { %1396 = vpow2.f32 %v1319_v20 }
 0xe2d   :  { %v1393_v19 = vpop.eup %1392 }
 0xe2e   :  { %801 = vrot.lane.b32.xlu1 %v1393_v19, %s1501_s21  ;;  %v1395_v6 = vpop.eup %1394 }
 0xe2f   :  { %v559_v21 = vadd.f32 1.0, %v1395_v6  ;;  %v1397_v22 = vpop.eup %1396 }
 0xe30   :  { %v782_v23 = vadd.f32 1.0, %v1397_v22 }
 0xe31   :  { %1398 = vrcp.f32 %v559_v21  ;;  %v571_v32 = vand.u32 2147483648, %v559_v21  ;;  %vm565_vm13 = vweird.f32 %v559_v21  ;;  %v569_v33 = vand.u32 2147483647, %v559_v21 }
 0xe32   :  { %1400 = vrcp.f32 %v782_v23  ;;  %v794_v41 = vand.u32 2147483648, %v782_v23  ;;  %vm788_vm2 = vweird.f32 %v782_v23  ;;  %v792_v42 = vand.u32 2147483647, %v782_v23 }
 0xe33   :  { %v572_v36 = vor.u32 1.1754944e-38, %v571_v32  ;;  %vm570_vm15 = vcmp.eq.f32.partialorder %v569_v33, 8.507059e+37  ;;  %v727_v33 = vpop.f32.mrf.mxu3 }
 0xe34   :  { %v795_v44 = vor.u32 1.1754944e-38, %v794_v41  ;;  %vm793_vm4 = vcmp.eq.f32.partialorder %v792_v42, 8.507059e+37 }
 0xe37   :  { %v1399_v24 = vpop.eup %1398 }
 0xe38   :  { %v561_v25 = vmul.f32 %v1399_v24, %v559_v21  ;;  %v1401_v27 = vpop.eup %1400  ;;  %vm566_vm12 = vweird.f32 %v1399_v24 }
 0xe39   :  { %v784_v29 = vmul.f32 %v1401_v27, %v782_v23  ;;  %vm567_vm14 = vmor %vm565_vm13, %vm566_vm12  ;;  %vm789_vm1 = vweird.f32 %v1401_v27 }
 0xe3a   :  { %v562_v26 = vsub.f32 1.0, %v561_v25  ;;  %vm790_vm3 = vmor %vm788_vm2, %vm789_vm1 }
 0xe3b   :  { %v785_v31 = vsub.f32 1.0, %v784_v29 }
 0xe3c   :  { %v563_v28 = vmul.f32 %v1399_v24, %v562_v26 }
 0xe3d   :  { %v786_v35 = vmul.f32 %v1401_v27, %v785_v31 }
 0xe3e   :  { %v564_v30 = vadd.f32 %v1399_v24, %v563_v28 }
 0xe3f   :  { %v787_v40 = vadd.f32 %v1401_v27, %v786_v35 }
 0xe40   :  { %v568_v34 = vsel %vm567_vm14, %v1399_v24, %v564_v30 }
 0xe41   :  { %v573_v38 = vsel %vm570_vm15, %v572_v36, %v568_v34  ;;  %v791_v43 = vsel %vm790_vm3, %v1401_v27, %v787_v40  ;;  %v728_v34 = vadd.f32 %v1730_v17, %v727_v33 }
 0xe42   :  { %v796_v46 = vsel %vm793_vm4, %v795_v44, %v791_v43  ;;  %v576_v48 = vmul.f32 %v573_v38, %v1689_v60  ;;  %v49_v60 = vld [vmem:[%s1859_s0 + $0x38] sm:$0xff] }
 0xe43   :  { %v799_v52 = vmul.f32 0.0, %v796_v46  ;;  %1295 = vmatmul.msk.f32.gmra.mxu0 %vm56_vm0, %v49_v60 }
 0xe98   :  { %v579_v37 = vpop.permute.xlu0 %578 }
 0xe99   :  { %v581_v39 = vmul.f32 %v579_v37, %v573_v38 }
 0xe9b   :  { %583 = vrot.lane.b32.xlu2 %v581_v39, %s1502_s22 }
 0xea0   :  { %v802_v45 = vpop.permute.xlu1 %801 }
 0xea1   :  { %v804_v47 = vmul.f32 %v802_v45, %v796_v46 }
 0xea3   :  { %806 = vrot.lane.b32.xlu0 %v804_v47, %s1502_s22 }
 0xef5   :  { %v584_v49 = vpop.permute.xlu2 %583 }
 0xef6   :  { %v1738_v50 = vadd.f32 %v584_v49, %v576_v48 }
 0xef8   :  { %1402 = vtanh.f32 %v1738_v50 }
 0xefe   :  { %v1403_v51 = vpop.eup %1402 }
 0xeff   :  { %589 = vrot.lane.b32.xlu1 %v1403_v51, %s1501_s21 }
 0xf15   :  { %v807_v53 = vpop.permute.xlu0 %806 }
 0xf16   :  { %v809_v54 = vadd.f32 %v807_v53, %v799_v52 }
 0xf18   :  { %1404 = vtanh.f32 %v809_v54 }
 0xf1e   :  { %v1405_v55 = vpop.eup %1404 }
 0xf1f   :  { %812 = vrot.lane.b32.xlu2 %v1405_v55, %s1501_s21 }
 0xf71   :  { %v590_v56 = vpop.permute.xlu1 %589 }
 0xf72   :  { %v592_v57 = vmul.f32 %v590_v56, %v573_v38 }
 0xf74   :  { %594 = vrot.lane.b32.xlu0 %v592_v57, %s1502_s22 }
 0xf79   :  { %v813_v58 = vpop.permute.xlu2 %812 }
 0xf7a   :  { %v815_v59 = vmul.f32 %v813_v58, %v796_v46 }
 0xf7c   :  { %817 = vrot.lane.b32.xlu1 %v815_v59, %s1502_s22 }
 0xfe6   :  { %v595_v61 = vpop.permute.xlu0 %594 }
 0xfe7   :  { %597 = vst.msk [vmem:[#allocation3 + $0x30] sm:$0xff] %vm135_vm5, %v595_v61  ;;  %1309 = vmatmul.msk.f32.vlgmr.msrb.gmra.mxu2 %vm135_vm5, %v595_v61  ;;  %v730_v61 = vpop.f32.mrf.mxu3 }
 0xfe8   :  { %968 = vmatpush.msrb.mxu2 %v1698_v3 }
 0xfea   :  { %969 = vmatpush.msrb.mxu2 %v1700_v4 }
 0xfec   :  { %970 = vmatpush.msrb.mxu2 %v1704_v9 }
 0xfee   :  { %v818_v62 = vpop.permute.xlu1 %817  ;;  %v670_v63 = vld [vmem:[#allocation3 + $0x30] sm:$0xff]  ;;  %971 = vmatpush.msrb.mxu2 %v1708_v10 }
 0xfef   :  { %820 = vst.msk [vmem:[%s1866_s7] sm:$0xff] %vm135_vm5, %v818_v62  ;;  %1317 = vmatmul.msk.f32.gmra.mxu3 %vm135_vm5, %v670_v63  ;;  %1320 = vmatmul.msk.f32.vlgmr.msra.gmra.mxu2 %vm135_vm5, %v818_v62  ;;  %v731_v62 = vadd.f32 %v1730_v17, %v730_v61 }
 0xff0   :  { %1100 = vmatpush.msra.mxu2 %v1698_v3 }
 0xff2   :  { %1101 = vmatpush.msra.mxu2 %v1700_v4 }
 0xff4   :  { %1102 = vmatpush.msra.mxu2 %v1704_v9 }
 0xff6   :  { %1103 = vmatpush.msra.mxu2 %v1708_v10 }
0x106a   :  { %v1765_v1 = vpop.f32.mrf.mxu2 }
0x1072   :  { %v841_v13 = vpop.f32.mrf.mxu2 }
0x1073   :  { %v844_v14 = vadd.f32 %v841_v13, %v725_v12 }
0x1075   :  { %1406 = vtanh.f32 %v844_v14  ;;  %v1321_v16 = vmul.f32 -1.442695, %v844_v14 }
0x1077   :  { %1408 = vpow2.f32 %v1321_v16 }
0x107b   :  { %v1407_v15 = vpop.eup %1406 }
0x107c   :  { %867 = vrot.lane.b32.xlu2 %v1407_v15, %s1501_s21 }
0x107d   :  { %v1409_v7 = vpop.eup %1408 }
0x107e   :  { %v848_v18 = vadd.f32 1.0, %v1409_v7 }
0x1080   :  { %1410 = vrcp.f32 %v848_v18  ;;  %v860_v20 = vand.u32 2147483648, %v848_v18  ;;  %vm854_vm6 = vweird.f32 %v848_v18  ;;  %v858_v6 = vand.u32 2147483647, %v848_v18 }
0x1082   :  { %v861_v22 = vor.u32 1.1754944e-38, %v860_v20  ;;  %vm859_vm8 = vcmp.eq.f32.partialorder %v858_v6, 8.507059e+37 }
0x1086   :  { %v1411_v0 = vpop.eup %1410 }
0x1087   :  { %v850_v2 = vmul.f32 %v1411_v0, %v848_v18  ;;  %vm855_vm0 = vweird.f32 %v1411_v0 }
0x1088   :  { %vm856_vm7 = vmor %vm854_vm6, %vm855_vm0 }
0x1089   :  { %v851_v5 = vsub.f32 1.0, %v850_v2 }
0x108b   :  { %v852_v19 = vmul.f32 %v1411_v0, %v851_v5 }
0x108d   :  { %v853_v8 = vadd.f32 %v1411_v0, %v852_v19 }
0x108f   :  { %v857_v21 = vsel %vm856_vm7, %v1411_v0, %v853_v8 }
0x1090   :  { %v862_v24 = vsel %vm859_vm8, %v861_v22, %v857_v21 }
0x1091   :  { %v865_v26 = vmul.f32 %v862_v24, %v809_v54 }
0x10d6   :  { %v868_v23 = vpop.permute.xlu2 %867 }
0x10d7   :  { %v870_v25 = vmul.f32 %v868_v23, %v862_v24 }
0x10d9   :  { %872 = vrot.lane.b32.xlu0 %v870_v25, %s1502_s22 }
0x114b   :  { %v873_v27 = vpop.permute.xlu0 %872 }
0x114c   :  { %v875_v28 = vadd.f32 %v873_v27, %v865_v26  ;;  %v733_v26 = vpop.f32.mrf.mxu3 }
0x114d   :  { %v734_v27 = vadd.f32 %v1730_v17, %v733_v26 }
0x114e   :  { %1412 = vtanh.f32 %v875_v28 }
0x1154   :  { %v1413_v29 = vpop.eup %1412 }
0x1155   :  { %878 = vrot.lane.b32.xlu1 %v1413_v29, %s1501_s21 }
0x11c7   :  { %v879_v30 = vpop.permute.xlu1 %878 }
0x11c8   :  { %v881_v31 = vmul.f32 %v879_v30, %v862_v24 }
0x11ca   :  { %883 = vrot.lane.b32.xlu2 %v881_v31, %s1502_s22 }
0x1224   :  { %v884_v32 = vpop.permute.xlu2 %883 }
0x1225   :  { %886 = vst.msk [vmem:[%s1866_s7 + $0x8] sm:$0xff] %vm135_vm5, %v884_v32  ;;  %1322 = vmatmul.msk.f32.vlgmr.msrb.gmra.mxu1 %vm135_vm5, %v884_v32 }
0x1226   :  { %1166 = vmatpush.msrb.mxu1 %v1698_v3 }
0x1228   :  { %1167 = vmatpush.msrb.mxu1 %v1700_v4 }
0x122a   :  { %1168 = vmatpush.msrb.mxu1 %v1704_v9 }
0x122c   :  { %1169 = vmatpush.msrb.mxu1 %v1708_v10 }
0x12a2   :  { %v907_v35 = vpop.f32.mrf.mxu1 }
0x12a3   :  { %v910_v36 = vadd.f32 %v907_v35, %v728_v34 }
0x12a5   :  { %1414 = vtanh.f32 %v910_v36  ;;  %v1323_v38 = vmul.f32 -1.442695, %v910_v36 }
0x12a7   :  { %1416 = vpow2.f32 %v1323_v38 }
0x12ab   :  { %v1415_v37 = vpop.eup %1414 }
0x12ac   :  { %933 = vrot.lane.b32.xlu0 %v1415_v37, %s1501_s21 }
0x12ad   :  { %v1417_v39 = vpop.eup %1416 }
0x12ae   :  { %v914_v40 = vadd.f32 1.0, %v1417_v39 }
0x12b0   :  { %1418 = vrcp.f32 %v914_v40  ;;  %v926_v46 = vand.u32 2147483648, %v914_v40  ;;  %vm920_vm10 = vweird.f32 %v914_v40  ;;  %v924_v47 = vand.u32 2147483647, %v914_v40 }
0x12b2   :  { %v927_v49 = vor.u32 1.1754944e-38, %v926_v46  ;;  %vm925_vm12 = vcmp.eq.f32.partialorder %v924_v47, 8.507059e+37 }
0x12b6   :  { %v1419_v41 = vpop.eup %1418 }
0x12b7   :  { %v916_v42 = vmul.f32 %v1419_v41, %v914_v40  ;;  %vm921_vm9 = vweird.f32 %v1419_v41 }
0x12b8   :  { %vm922_vm11 = vmor %vm920_vm10, %vm921_vm9 }
0x12b9   :  { %v917_v43 = vsub.f32 1.0, %v916_v42 }
0x12bb   :  { %v918_v44 = vmul.f32 %v1419_v41, %v917_v43 }
0x12bd   :  { %v919_v45 = vadd.f32 %v1419_v41, %v918_v44 }
0x12bf   :  { %v923_v48 = vsel %vm922_vm11, %v1419_v41, %v919_v45 }
0x12c0   :  { %v928_v52 = vsel %vm925_vm12, %v927_v49, %v923_v48 }
0x12c1   :  { %v931_v54 = vmul.f32 %v928_v52, %v875_v28 }
0x131e   :  { %v934_v51 = vpop.permute.xlu0 %933 }
0x131f   :  { %v936_v53 = vmul.f32 %v934_v51, %v928_v52 }
0x1321   :  { %938 = vrot.lane.b32.xlu1 %v936_v53, %s1502_s22 }
0x1393   :  { %v939_v55 = vpop.permute.xlu1 %938 }
0x1394   :  { %v941_v56 = vadd.f32 %v939_v55, %v931_v54  ;;  %v736_v54 = vpop.f32.mrf.mxu3 }
0x1395   :  { %v737_v55 = vadd.f32 %v1730_v17, %v736_v54 }
0x1396   :  { %1420 = vtanh.f32 %v941_v56 }
0x139c   :  { %v1421_v57 = vpop.eup %1420 }
0x139d   :  { %944 = vrot.lane.b32.xlu2 %v1421_v57, %s1501_s21 }
0x13f7   :  { %v945_v58 = vpop.permute.xlu2 %944 }
0x13f8   :  { %v947_v59 = vmul.f32 %v945_v58, %v928_v52 }
0x13fa   :  { %949 = vrot.lane.b32.xlu0 %v947_v59, %s1502_s22 }
0x146c   :  { %v950_v60 = vpop.permute.xlu0 %949 }
0x146d   :  { %952 = vst.msk [vmem:[%s1866_s7 + $0x10] sm:$0xff] %vm135_vm5, %v950_v60  ;;  %1324 = vmatmul.msk.f32.vlgmr.msrb.gmra.mxu2 %vm135_vm5, %v950_v60 }
0x146e   :  { %1232 = vmatpush.msrb.mxu2 %v1698_v3 }
0x1470   :  { %1233 = vmatpush.msrb.mxu2 %v1700_v4 }
0x1472   :  { %1234 = vmatpush.msrb.mxu2 %v1704_v9 }
0x1474   :  { %1235 = vmatpush.msrb.mxu2 %v1708_v10 }
0x14f0   :  { %v973_v63 = vpop.f32.mrf.mxu2 }
0x14f1   :  { %v976_v11 = vadd.f32 %v973_v63, %v731_v62 }
0x14f3   :  { %1422 = vtanh.f32 %v976_v11  ;;  %v1325_v13 = vmul.f32 -1.442695, %v976_v11 }
0x14f5   :  { %1424 = vpow2.f32 %v1325_v13  ;;  %v119_v13 = vpop.f32.mrf.mxu0 }
0x14f9   :  { %v1423_v12 = vpop.eup %1422 }
0x14fa   :  { %999 = vrot.lane.b32.xlu1 %v1423_v12, %s1501_s21 }
0x14fb   :  { %v1425_v14 = vpop.eup %1424 }
0x14fc   :  { %v980_v15 = vadd.f32 1.0, %v1425_v14 }
0x14fe   :  { %1426 = vrcp.f32 %v980_v15  ;;  %v992_v10 = vand.u32 2147483648, %v980_v15  ;;  %vm986_vm14 = vweird.f32 %v980_v15  ;;  %v990_v18 = vand.u32 2147483647, %v980_v15 }
0x1500   :  { %v993_v2 = vor.u32 1.1754944e-38, %v992_v10  ;;  %vm991_vm1 = vcmp.eq.f32.partialorder %v990_v18, 8.507059e+37 }
0x1504   :  { %v1427_v3 = vpop.eup %1426 }
0x1505   :  { %v982_v4 = vmul.f32 %v1427_v3, %v980_v15  ;;  %vm987_vm13 = vweird.f32 %v1427_v3 }
0x1506   :  { %vm988_vm15 = vmor %vm986_vm14, %vm987_vm13 }
0x1507   :  { %v983_v16 = vsub.f32 1.0, %v982_v4  ;;  %v1470_v4 = vld [vmem:[%s1861_s2] ss:$0 sm:$0xff] }
0x1509   :  { %v984_v9 = vmul.f32 %v1427_v3, %v983_v16  ;;  %v120_v16 = vadd.f32 %v1470_v4, %v119_v13 }
0x150b   :  { %v985_v7 = vadd.f32 %v1427_v3, %v984_v9  ;;  %v621_v10 = vadd.f32 %v1765_v1, %v120_v16 }
0x150d   :  { %v989_v0 = vsel %vm988_vm15, %v1427_v3, %v985_v7 }
0x150e   :  { %v994_v19 = vsel %vm991_vm1, %v993_v2, %v989_v0 }
0x150f   :  { %v997_v20 = vmul.f32 %v994_v19, %v941_v56 }
0x156c   :  { %v1000_v5 = vpop.permute.xlu1 %999 }
0x156d   :  { %v1002_v8 = vmul.f32 %v1000_v5, %v994_v19 }
0x156f   :  { %1004 = vrot.lane.b32.xlu2 %v1002_v8, %s1502_s22 }
0x15c9   :  { %v1005_v6 = vpop.permute.xlu2 %1004 }
0x15ca   :  { %v1007_v21 = vadd.f32 %v1005_v6, %v997_v20 }
0x15cc   :  { %1428 = vtanh.f32 %v1007_v21 }
0x15d2   :  { %v1429_v22 = vpop.eup %1428 }
0x15d3   :  { %1010 = vrot.lane.b32.xlu0 %v1429_v22, %s1501_s21 }
0x1645   :  { %v1011_v23 = vpop.permute.xlu0 %1010 }
0x1646   :  { %v1013_v24 = vmul.f32 %v1011_v23, %v994_v19 }
0x1648   :  { %1015 = vrot.lane.b32.xlu1 %v1013_v24, %s1502_s22 }
0x16ba   :  { %v1016_v25 = vpop.permute.xlu1 %1015 }
0x16bb   :  { %1018 = vst.msk [vmem:[%s1866_s7 + $0x18] sm:$0xff] %vm135_vm5, %v1016_v25  ;;  %1326 = vmatmul.msk.f32.vlgmr.msra.gmra.mxu1 %vm135_vm5, %v1016_v25 }
0x1738   :  { %v1039_v28 = vpop.f32.mrf.mxu1 }
0x1739   :  { %v1042_v29 = vadd.f32 %v1039_v28, %v734_v27 }
0x173b   :  { %1430 = vtanh.f32 %v1042_v29  ;;  %v1327_v31 = vmul.f32 -1.442695, %v1042_v29 }
0x173d   :  { %1432 = vpow2.f32 %v1327_v31 }
0x1741   :  { %v1431_v30 = vpop.eup %1430 }
0x1742   :  { %1065 = vrot.lane.b32.xlu2 %v1431_v30, %s1501_s21 }
0x1743   :  { %v1433_v32 = vpop.eup %1432 }
0x1744   :  { %v1046_v33 = vadd.f32 1.0, %v1433_v32 }
0x1746   :  { %1434 = vrcp.f32 %v1046_v33  ;;  %v1058_v39 = vand.u32 2147483648, %v1046_v33  ;;  %vm1052_vm3 = vweird.f32 %v1046_v33  ;;  %v1056_v40 = vand.u32 2147483647, %v1046_v33 }
0x1748   :  { %v1059_v42 = vor.u32 1.1754944e-38, %v1058_v39  ;;  %vm1057_vm0 = vcmp.eq.f32.partialorder %v1056_v40, 8.507059e+37 }
0x174c   :  { %v1435_v34 = vpop.eup %1434 }
0x174d   :  { %v1048_v35 = vmul.f32 %v1435_v34, %v1046_v33  ;;  %vm1053_vm2 = vweird.f32 %v1435_v34 }
0x174e   :  { %vm1054_vm4 = vmor %vm1052_vm3, %vm1053_vm2 }
0x174f   :  { %v1049_v36 = vsub.f32 1.0, %v1048_v35 }
0x1751   :  { %v1050_v37 = vmul.f32 %v1435_v34, %v1049_v36 }
0x1753   :  { %v1051_v38 = vadd.f32 %v1435_v34, %v1050_v37 }
0x1755   :  { %v1055_v41 = vsel %vm1054_vm4, %v1435_v34, %v1051_v38  ;;  %v739_v38 = vpop.f32.mrf.mxu3 }
0x1756   :  { %v1060_v44 = vsel %vm1057_vm0, %v1059_v42, %v1055_v41  ;;  %v740_v39 = vadd.f32 %v1730_v17, %v739_v38 }
0x1757   :  { %v1063_v46 = vmul.f32 %v1060_v44, %v1007_v21  ;;  %v1310_v21 = vmul.f32 -1.442695, %v621_v10 }
0x179c   :  { %v1066_v43 = vpop.permute.xlu2 %1065 }
0x179d   :  { %v1068_v45 = vmul.f32 %v1066_v43, %v1060_v44 }
0x179f   :  { %1070 = vrot.lane.b32.xlu0 %v1068_v45, %s1502_s22 }
0x1811   :  { %v1071_v47 = vpop.permute.xlu0 %1070 }
0x1812   :  { %v1073_v48 = vadd.f32 %v1071_v47, %v1063_v46 }
0x1814   :  { %1436 = vtanh.f32 %v1073_v48 }
0x181a   :  { %v1437_v49 = vpop.eup %1436 }
0x181b   :  { %1076 = vrot.lane.b32.xlu1 %v1437_v49, %s1501_s21 }
0x188d   :  { %v1077_v51 = vpop.permute.xlu1 %1076 }
0x188e   :  { %v1079_v52 = vmul.f32 %v1077_v51, %v1060_v44 }
0x1890   :  { %1081 = vrot.lane.b32.xlu2 %v1079_v52, %s1502_s22 }
0x18ea   :  { %v1082_v53 = vpop.permute.xlu2 %1081 }
0x18eb   :  { %1084 = vst.msk [vmem:[%s1866_s7 + $0x20] sm:$0xff] %vm135_vm5, %v1082_v53  ;;  %1328 = vmatmul.msk.f32.vlgmr.msra.gmra.mxu2 %vm135_vm5, %v1082_v53 }
0x196e   :  { %v1105_v56 = vpop.f32.mrf.mxu2 }
0x196f   :  { %v1108_v57 = vadd.f32 %v1105_v56, %v737_v55 }
0x1971   :  { %1438 = vtanh.f32 %v1108_v57  ;;  %v1329_v59 = vmul.f32 -1.442695, %v1108_v57 }
0x1973   :  { %1440 = vpow2.f32 %v1329_v59 }
0x1977   :  { %v1439_v58 = vpop.eup %1438 }
0x1978   :  { %1131 = vrot.lane.b32.xlu0 %v1439_v58, %s1501_s21 }
0x1979   :  { %v1441_v60 = vpop.eup %1440 }
0x197a   :  { %v1112_v61 = vadd.f32 1.0, %v1441_v60 }
0x197c   :  { %1442 = vrcp.f32 %v1112_v61  ;;  %v1124_v15 = vand.u32 2147483648, %v1112_v61  ;;  %vm1118_vm7 = vweird.f32 %v1112_v61  ;;  %v1122_v3 = vand.u32 2147483647, %v1112_v61 }
0x197d   :  { %1444 = vtanh.f32 %v621_v10 }
0x197e   :  { %v1125_v7 = vor.u32 1.1754944e-38, %v1124_v15  ;;  %vm1123_vm9 = vcmp.eq.f32.partialorder %v1122_v3, 8.507059e+37 }
0x1982   :  { %v1443_v62 = vpop.eup %1442 }
0x1983   :  { %v1114_v63 = vmul.f32 %v1443_v62, %v1112_v61  ;;  %vm1119_vm6 = vweird.f32 %v1443_v62  ;;  %v1445_v5 = vpop.eup %1444 }
0x1984   :  { %vm1120_vm8 = vmor %vm1118_vm7, %vm1119_vm6 }
0x1985   :  { %v1115_v11 = vsub.f32 1.0, %v1114_v63 }
0x1987   :  { %v1116_v12 = vmul.f32 %v1443_v62, %v1115_v11 }
0x1989   :  { %v1117_v14 = vadd.f32 %v1443_v62, %v1116_v12 }
0x198b   :  { %v1121_v9 = vsel %vm1120_vm8, %v1443_v62, %v1117_v14 }
0x198c   :  { %v1126_v0 = vsel %vm1123_vm9, %v1125_v7, %v1121_v9 }
0x198d   :  { %v1129_v19 = vmul.f32 %v1126_v0, %v1073_v48 }
0x19ea   :  { %v1132_v18 = vpop.permute.xlu0 %1131 }
0x19eb   :  { %v1134_v2 = vmul.f32 %v1132_v18, %v1126_v0 }
0x19ed   :  { %1136 = vrot.lane.b32.xlu1 %v1134_v2, %s1502_s22 }
0x19f5   :  { %644 = vrot.lane.b32.xlu1 %v1445_v5, %s1501_s21 }
0x1a5f   :  { %v1137_v8 = vpop.permute.xlu1 %1136 }
0x1a60   :  { %v1823_v20 = vadd.f32 %v1137_v8, %v1129_v19 }
0x1a62   :  { %1446 = vtanh.f32 %v1823_v20 }
0x1a63   :  { %1448 = vpow2.f32 %v1310_v21 }
0x1a67   :  { %v645_v34 = vpop.permute.xlu1 %644 }
0x1a68   :  { %v1447_v6 = vpop.eup %1446 }
0x1a69   :  { %1142 = vrot.lane.b32.xlu2 %v1447_v6, %s1501_s21  ;;  %v1449_v1 = vpop.eup %1448 }
0x1a6a   :  { %v625_v22 = vadd.f32 1.0, %v1449_v1 }
0x1a6c   :  { %1450 = vrcp.f32 %v625_v22  ;;  %v637_v30 = vand.u32 2147483648, %v625_v22  ;;  %vm631_vm11 = vweird.f32 %v625_v22  ;;  %v635_v31 = vand.u32 2147483647, %v625_v22 }
0x1a6e   :  { %v638_v33 = vor.u32 1.1754944e-38, %v637_v30  ;;  %vm636_vm13 = vcmp.eq.f32.partialorder %v635_v31, 8.507059e+37 }
0x1a72   :  { %v1451_v23 = vpop.eup %1450 }
0x1a73   :  { %v627_v24 = vmul.f32 %v1451_v23, %v625_v22  ;;  %vm632_vm10 = vweird.f32 %v1451_v23 }
0x1a74   :  { %vm633_vm12 = vmor %vm631_vm11, %vm632_vm10 }
0x1a75   :  { %v628_v25 = vsub.f32 1.0, %v627_v24 }
0x1a77   :  { %v629_v26 = vmul.f32 %v1451_v23, %v628_v25 }
0x1a79   :  { %v630_v28 = vadd.f32 %v1451_v23, %v629_v26 }
0x1a7b   :  { %v634_v32 = vsel %vm633_vm12, %v1451_v23, %v630_v28 }
0x1a7c   :  { %v639_v35 = vsel %vm636_vm13, %v638_v33, %v634_v32 }
0x1a7d   :  { %v647_v36 = vmul.f32 %v645_v34, %v639_v35  ;;  %v642_v43 = vmul.f32 %v639_v35, %v1738_v50 }
0x1ac3   :  { %v1143_v27 = vpop.permute.xlu2 %1142 }
0x1ac4   :  { %v1145_v29 = vmul.f32 %v1143_v27, %v1126_v0 }
0x1ac6   :  { %1147 = vrot.lane.b32.xlu0 %v1145_v29, %s1502_s22 }
0x1ace   :  { %649 = vrot.lane.b32.xlu0 %v647_v36, %s1502_s22 }
0x1b38   :  { %v1148_v37 = vpop.permute.xlu0 %1147 }
0x1b39   :  { %1150 = vst.msk [vmem:[%s1866_s7 + $0x28] sm:$0xff] %vm135_vm5, %v1148_v37  ;;  %1330 = vmatmul.msk.f32.vlgmr.msrb.gmra.mxu1 %vm135_vm5, %v1148_v37 }
0x1b40   :  { %v650_v42 = vpop.permute.xlu0 %649 }
0x1b41   :  { %v652_v44 = vadd.f32 %v650_v42, %v642_v43 }
0x1bb6   :  { %v1171_v40 = vpop.f32.mrf.mxu1 }
0x1bb7   :  { %v1174_v41 = vadd.f32 %v1171_v40, %v740_v39 }
0x1bb9   :  { %1452 = vtanh.f32 %v1174_v41  ;;  %v1331_v47 = vmul.f32 -1.442695, %v1174_v41 }
0x1bba   :  { %1454 = vtanh.f32 %v652_v44 }
0x1bbb   :  { %1456 = vpow2.f32 %v1331_v47 }
0x1bbf   :  { %v1453_v45 = vpop.eup %1452 }
0x1bc0   :  { %1197 = vrot.lane.b32.xlu2 %v1453_v45, %s1501_s21  ;;  %v1455_v46 = vpop.eup %1454 }
0x1bc1   :  { %v1457_v48 = vpop.eup %1456 }
0x1bc2   :  { %v1178_v49 = vadd.f32 1.0, %v1457_v48 }
0x1bc4   :  { %1458 = vrcp.f32 %v1178_v49  ;;  %v1190_v50 = vand.u32 2147483648, %v1178_v49  ;;  %vm1184_vm15 = vweird.f32 %v1178_v49  ;;  %v1188_v56 = vand.u32 2147483647, %v1178_v49 }
0x1bc6   :  { %v1191_v58 = vor.u32 1.1754944e-38, %v1190_v50  ;;  %vm1189_vm2 = vcmp.eq.f32.partialorder %v1188_v56, 8.507059e+37 }
0x1bc8   :  { %655 = vrot.lane.b32.xlu2 %v1455_v46, %s1501_s21 }
0x1bca   :  { %v1459_v51 = vpop.eup %1458 }
0x1bcb   :  { %v1180_v52 = vmul.f32 %v1459_v51, %v1178_v49  ;;  %vm1185_vm14 = vweird.f32 %v1459_v51 }
0x1bcc   :  { %vm1186_vm1 = vmor %vm1184_vm15, %vm1185_vm14 }
0x1bcd   :  { %v1181_v53 = vsub.f32 1.0, %v1180_v52 }
0x1bcf   :  { %v1182_v54 = vmul.f32 %v1459_v51, %v1181_v53 }
0x1bd1   :  { %v1183_v55 = vadd.f32 %v1459_v51, %v1182_v54 }
0x1bd3   :  { %v1187_v57 = vsel %vm1186_vm1, %v1459_v51, %v1183_v55 }
0x1bd4   :  { %v1192_v60 = vsel %vm1189_vm2, %v1191_v58, %v1187_v57 }
0x1bd5   :  { %v1195_v11 = vmul.f32 %v1192_v60, %v1823_v20 }
0x1c1a   :  { %v1198_v59 = vpop.permute.xlu2 %1197 }
0x1c1b   :  { %v1200_v61 = vmul.f32 %v1198_v59, %v1192_v60 }
0x1c1d   :  { %1202 = vrot.lane.b32.xlu1 %v1200_v61, %s1502_s22 }
0x1c22   :  { %v656_v62 = vpop.permute.xlu2 %655 }
0x1c23   :  { %v658_v63 = vmul.f32 %v656_v62, %v639_v35 }
0x1c25   :  { %660 = vrot.lane.b32.xlu1 %v658_v63, %s1502_s22 }
0x1c8f   :  { %v1203_v12 = vpop.permute.xlu1 %1202 }
0x1c90   :  { %v1205_v13 = vadd.f32 %v1203_v12, %v1195_v11 }
0x1c92   :  { %1460 = vtanh.f32 %v1205_v13 }
0x1c97   :  { %v661_v14 = vpop.permute.xlu1 %660 }
0x1c98   :  { %v1461_v15 = vpop.eup %1460  ;;  %663 = vst.msk [vmem:[#allocation3 + $0x38] sm:$0xff] %vm135_vm5, %v661_v14 }
0x1c99   :  { %1208 = vrot.lane.b32.xlu0 %v1461_v15, %s1501_s21 }
0x1c9f   :  { %v671_v3 = vld [vmem:[#allocation3 + $0x38] sm:$0xff] }
0x1ca0   :  { %1318 = vmatmul.msk.f32.gmra.mxu3 %vm135_vm5, %v671_v3 }
0x1d0b   :  { %v1209_v4 = vpop.permute.xlu0 %1208 }
0x1d0c   :  { %v1211_v16 = vmul.f32 %v1209_v4, %v1192_v60 }
0x1d0e   :  { %1213 = vrot.lane.b32.xlu2 %v1211_v16, %s1502_s22 }
0x1d23   :  { %v742_v7 = vpop.f32.mrf.mxu3 }
0x1d24   :  { %v743_v10 = vadd.f32 %v1730_v17, %v742_v7 }
0x1d68   :  { %v1214_v9 = vpop.permute.xlu2 %1213 }
0x1d69   :  { %1216 = vst.msk [vmem:[%s1866_s7 + $0x30] sm:$0xff] %vm135_vm5, %v1214_v9  ;;  %1332 = vmatmul.msk.f32.vlgmr.msrb.gmra.mxu2 %vm135_vm5, %v1214_v9 }
0x1dec   :  { %v1237_v18 = vpop.f32.mrf.mxu2 }
0x1ded   :  { %v1240_v0 = vadd.f32 %v1237_v18, %v743_v10 }
0x1def   :  { %1462 = vtanh.f32 %v1240_v0  ;;  %v1333_v5 = vmul.f32 -1.442695, %v1240_v0 }
0x1df1   :  { %1464 = vpow2.f32 %v1333_v5 }
0x1df5   :  { %v1463_v2 = vpop.eup %1462 }
0x1df6   :  { %1263 = vrot.lane.b32.xlu0 %v1463_v2, %s1501_s21 }
0x1df7   :  { %v1465_v19 = vpop.eup %1464 }
0x1df8   :  { %v1244_v8 = vadd.f32 1.0, %v1465_v19 }
0x1dfa   :  { %1466 = vrcp.f32 %v1244_v8  ;;  %v1256_v23 = vand.u32 2147483648, %v1244_v8  ;;  %vm1250_vm4 = vweird.f32 %v1244_v8  ;;  %v1254_v17 = vand.u32 2147483647, %v1244_v8 }
0x1dfc   :  { %v1257_v25 = vor.u32 1.1754944e-38, %v1256_v23  ;;  %vm1255_vm6 = vcmp.eq.f32.partialorder %v1254_v17, 8.507059e+37 }
0x1e00   :  { %v1467_v20 = vpop.eup %1466 }
0x1e01   :  { %v1246_v6 = vmul.f32 %v1467_v20, %v1244_v8  ;;  %vm1251_vm3 = vweird.f32 %v1467_v20 }
0x1e02   :  { %vm1252_vm0 = vmor %vm1250_vm4, %vm1251_vm3 }
0x1e03   :  { %v1247_v21 = vsub.f32 1.0, %v1246_v6 }
0x1e05   :  { %v1248_v1 = vmul.f32 %v1467_v20, %v1247_v21 }
0x1e07   :  { %v1249_v22 = vadd.f32 %v1467_v20, %v1248_v1 }
0x1e09   :  { %v1253_v24 = vsel %vm1252_vm0, %v1467_v20, %v1249_v22 }
0x1e0a   :  { %v1258_v27 = vsel %vm1255_vm6, %v1257_v25, %v1253_v24 }
0x1e0b   :  { %v1261_v29 = vmul.f32 %v1258_v27, %v1205_v13 }
0x1e68   :  { %v1264_v26 = vpop.permute.xlu0 %1263 }
0x1e69   :  { %v1266_v28 = vmul.f32 %v1264_v26, %v1258_v27 }
0x1e6b   :  { %1268 = vrot.lane.b32.xlu1 %v1266_v28, %s1502_s22 }
0x1edd   :  { %v1269_v30 = vpop.permute.xlu1 %1268 }
0x1ede   :  { %v1271_v31 = vadd.f32 %v1269_v30, %v1261_v29 }
0x1ee0   :  { %1468 = vtanh.f32 %v1271_v31 }
0x1ee6   :  { %v1469_v32 = vpop.eup %1468 }
0x1ee7   :  { %1274 = vrot.lane.b32.xlu2 %v1469_v32, %s1501_s21 }
0x1f41   :  { %v1275_v33 = vpop.permute.xlu2 %1274 }
0x1f42   :  { %v1277_v34 = vmul.f32 %v1275_v33, %v1258_v27 }
0x1f44   :  { %1279 = vrot.lane.b32.xlu0 %v1277_v34, %s1502_s22 }
0x1fb6   :  { %v1280_v35 = vpop.permute.xlu0 %1279 }
0x1fb7   :  { %1282 = vst.msk [vmem:[%s1866_s7 + $0x38] sm:$0xff] %vm135_vm5, %v1280_v35 }
0x1fb8   :  { %1287 = vsyncpa [#allocation5], 1 }

</bundles_post_ra>
